<compile_context>
chip_gen: v7x
topology: tpu7x:2x2x1
jax: 0.10.0
libtpu: 0.0.40
codegen_flags: <defaults>
</compile_context>

<pallas_src>
import functools

import jax
import jax.numpy as jnp
import numpy as np
from jax.experimental import pallas as pl
from jax.experimental.pallas import tpu as pltpu


def _round_up(x, m):
    return ((x + m - 1) // m) * m


# ---------------------------------------------------------------------------
# Pallas kernel: grid over HW tiles of the im2col patches.
#   per step : conv-as-matmul (bf16 MXU, f32 acc) + ReLU + per-batch spatial
#              sum accumulated into a VMEM scratch (GAP numerator)
#   last step: finish GAP, question Linear+tanh, fuse, classifier head
# ---------------------------------------------------------------------------
def vqa_classifier_kernel(patches_ref,   # (Bp, THW, K)  bf16 im2col tile
                          conv_w_ref,    # (K, Cfp)      bf16
                          conv_b_ref,    # (1, Cfp)      f32
                          q_ref,         # (Bp, E)       bf16 mean-pooled question
                          q_w_ref,       # (E, Cfp)      bf16
                          q_b_ref,       # (1, Cfp)      f32
                          cls_w_ref,     # (Cfp, NCp)    bf16
                          cls_b_ref,     # (1, NCp)      f32
                          out_ref,       # (Bp, NCp)     f32
                          acc_ref,       # VMEM (Bp, Cfp) f32  GAP accumulator
                          *, inv_hw):
    step = pl.program_id(0)

    @pl.when(step == 0)
    def _():
        acc_ref[...] = jnp.zeros_like(acc_ref)

    # ---- image branch: conv (im2col matmul) + ReLU, spatial sum per batch ----
    cw = conv_w_ref[...]          # hoisted: read weights / bias once per step
    cb = conv_b_ref[...]
    bp = patches_ref.shape[0]
    rows = []
    for b in range(bp):           # static, tiny (Bp = 8)
        h_b = jnp.dot(patches_ref[b], cw,
                      preferred_element_type=jnp.float32)         # (THW, Cfp)
        h_b = jnp.maximum(h_b + cb, 0.0)                          # bias + ReLU
        rows.append(jnp.sum(h_b, axis=0, keepdims=True))          # (1, Cfp)
    acc_ref[...] += jnp.concatenate(rows, axis=0)                 # (Bp, Cfp)

    # ---- last HW tile: finish GAP, question branch, fusion, head --------------
    @pl.when(step == pl.num_programs(0) - 1)
    def _():
        img_feat = acc_ref[...] * inv_hw                          # (Bp, Cfp)
        q_feat = jnp.tanh(
            jnp.dot(q_ref[...], q_w_ref[...],
                    preferred_element_type=jnp.float32) + q_b_ref[...])
        fused = (img_feat * q_feat).astype(jnp.bfloat16)          # (Bp, Cfp)
        logits = jnp.dot(fused, cls_w_ref[...],
                         preferred_element_type=jnp.float32) + cls_b_ref[...]
        out_ref[...] = logits.astype(out_ref.dtype)               # lane-dense store


# ---------------------------------------------------------------------------
# Glue: im2col (NCHW, k=3, pad=1, stride=1) -> [B, HW, C*k*k]
# ---------------------------------------------------------------------------
def im2col_nchw(img, k=3, pad=1):
    B, C, H, W = img.shape
    xp = jnp.pad(img, ((0, 0), (0, 0), (pad, pad), (pad, pad)))
    cols = []
    for dh in range(k):
        for dw in range(k):
            cols.append(xp[:, :, dh:dh + H, dw:dw + W])           # [B, C, H, W]
    p = jnp.stack(cols, axis=2)                                   # [B, C, k*k, H, W]
    p = p.transpose(0, 3, 4, 1, 2)                                # [B, H, W, C, k*k]
    return p.reshape(B, H * W, C * k * k)                         # [B, HW, K]


# ---------------------------------------------------------------------------
# Wrapper
# ---------------------------------------------------------------------------
def classifier_forward(img, que, params, *, tile_hw=128):
    """img: [B, C, H, W] float32 (NCHW), que: [B, S] int32 token ids."""
    B, C, H, W = img.shape
    HW = H * W

    conv_w, conv_b = params["conv_w"], params["conv_b"]
    emb_tbl, q_w, q_b = params["emb"], params["q_w"], params["q_b"]
    cls_w, cls_b = params["cls_w"], params["cls_b"]

    K, Cf = conv_w.shape
    E = emb_tbl.shape[1]
    NC = cls_w.shape[1]

    LANE, SUB = 128, 8
    Bp = _round_up(B, SUB)
    Cfp = _round_up(Cf, LANE)       # keep fusion/head lane widths dense
    NCp = _round_up(NC, LANE)       # lane-dense output slab

    # HW tile size: multiple of 8 that divides HW (multi-step pipelined grid).
    thw = min(tile_hw, HW)
    while HW % thw != 0 and thw > SUB:
        thw //= 2
    thw = max(thw, SUB)
    assert HW % thw == 0 and thw % SUB == 0, (HW, thw)
    n_tiles = HW // thw

    bf16, f32 = jnp.bfloat16, jnp.float32

    # ---- wrapper-side glue (embedding gather / mean-pool / im2col fuse in XLA)
    patches = im2col_nchw(img)                                    # [B, HW, K]
    patches = jnp.pad(patches, ((0, Bp - B), (0, 0), (0, 0))).astype(bf16)

    # question mean-pool in the wrapper (fuses into the embedding gather).
    q_pool = jnp.mean(jnp.take(emb_tbl, que, axis=0), axis=1)     # [B, E]
    q_pool = jnp.pad(q_pool, ((0, Bp - B), (0, 0))).astype(bf16)

    conv_w_p = jnp.pad(conv_w, ((0, 0), (0, Cfp - Cf))).astype(bf16)
    conv_b_p = jnp.pad(conv_b.reshape(1, Cf), ((0, 0), (0, Cfp - Cf))).astype(f32)
    q_w_p = jnp.pad(q_w, ((0, 0), (0, Cfp - Cf))).astype(bf16)
    q_b_p = jnp.pad(q_b.reshape(1, Cf), ((0, 0), (0, Cfp - Cf))).astype(f32)
    cls_w_p = jnp.pad(cls_w, ((0, Cfp - Cf), (0, NCp - NC))).astype(bf16)
    cls_b_p = jnp.pad(cls_b.reshape(1, NC), ((0, 0), (0, NCp - NC))).astype(f32)

    kernel = functools.partial(vqa_classifier_kernel, inv_hw=1.0 / HW)

    flops = 2 * (Bp * HW * K * Cfp          # conv matmul
                 + Bp * E * Cfp             # question linear
                 + Bp * Cfp * NCp)          # classifier head
    bytes_accessed = (2 * (patches.size + conv_w_p.size + q_pool.size
                           + q_w_p.size + cls_w_p.size)           # bf16 inputs
                      + 4 * (conv_b_p.size + q_b_p.size + cls_b_p.size
                             + Bp * NCp))                          # f32 bias/out

    def const(shape):
        n = len(shape)
        return pl.BlockSpec(shape, lambda t, _n=n: (0,) * _n)

    out = pl.pallas_call(
        kernel,
        out_shape=jax.ShapeDtypeStruct((Bp, NCp), jnp.float32),
        grid_spec=pltpu.PrefetchScalarGridSpec(
            num_scalar_prefetch=0,
            grid=(n_tiles,),
            in_specs=[
                pl.BlockSpec((Bp, thw, K), lambda t: (0, t, 0)),   # patches (HW-tiled)
                const((K, Cfp)),       # conv_w
                const((1, Cfp)),       # conv_b
                const((Bp, E)),        # q_pool
                const((E, Cfp)),       # q_w
                const((1, Cfp)),       # q_b
                const((Cfp, NCp)),     # cls_w
                const((1, NCp)),       # cls_b
            ],
            out_specs=const((Bp, NCp)),
            scratch_shapes=[pltpu.VMEM((Bp, Cfp), jnp.float32)],
        ),
        compiler_params=pltpu.CompilerParams(
            dimension_semantics=("arbitrary",)),   # HW axis is the GAP reduction
        cost_estimate=pl.CostEstimate(
            flops=flops,
            transcendentals=Bp * Cfp,              # tanh
            bytes_accessed=int(bytes_accessed)),
    )(patches, conv_w_p, conv_b_p, q_pool, q_w_p, q_b_p, cls_w_p, cls_b_p)

    return out[:B, :NC]


# Pure-JAX reference (same math, f32) for a correctness check.
def classifier_forward_ref(img, que, params):
    patches = im2col_nchw(img)
    h = jnp.maximum(patches @ params["conv_w"] + params["conv_b"], 0.0)
    img_feat = jnp.mean(h, axis=1)                                   # [B, Cf]
    q = jnp.mean(jnp.take(params["emb"], que, axis=0), axis=1)       # [B, E]
    q_feat = jnp.tanh(q @ params["q_w"] + params["q_b"])
    fused = img_feat * q_feat
    return fused @ params["cls_w"] + params["cls_b"]


if __name__ == "__main__":
    # Small shapes consistent with the module's forward(img, que).
    B, Cin, H, W = 2, 4, 16, 16
    S, vocab, E = 8, 50, 32
    Cf, NC = 32, 16          # backbone feature dim / number of classes
    K = Cin * 3 * 3

    key = jax.random.PRNGKey(0)
    k_img, k_que, k1, k2, k3, k4, k5 = jax.random.split(key, 7)

    img = jax.random.normal(k_img, (B, Cin, H, W), dtype=jnp.float32)
    que = jax.random.randint(k_que, (B, S), 0, vocab, dtype=jnp.int32)

    params = {
        # conv weight stored pre-flattened as [Cin*kh*kw, Cout] (matches im2col order)
        "conv_w": jax.random.normal(k1, (K, Cf), dtype=jnp.float32) * 0.1,
        "conv_b": jnp.zeros((1, Cf), dtype=jnp.float32),
        "emb":    jax.random.normal(k2, (vocab, E), dtype=jnp.float32) * 0.1,
        "q_w":    jax.random.normal(k3, (E, Cf), dtype=jnp.float32) * 0.1,
        "q_b":    jnp.zeros((1, Cf), dtype=jnp.float32),
        "cls_w":  jax.random.normal(k4, (Cf, NC), dtype=jnp.float32) * 0.1,
        "cls_b":  jax.random.normal(k5, (1, NC), dtype=jnp.float32) * 0.01,
    }

    out = classifier_forward(img, que, params)
    out = jax.block_until_ready(out)

    ref = classifier_forward_ref(img, que, params)
    # bf16 MXU operands (f32 accumulate) -> relaxed tolerance vs. f32 reference.
    np.testing.assert_allclose(np.asarray(out), np.asarray(ref),
                               rtol=2e-2, atol=2e-2)
    assert out.shape == (B, NC)
    print("KERNEL_OK")
</pallas_src>

<mosaic_0001>
module attributes {stable_mosaic.version = 11 : i64} {
  func.func @vqa_classifier_kernel(%arg0: i32, %arg1: memref<8x128x36xbf16, #tpu.memory_space<vmem>>, %arg2: memref<36x128xbf16, #tpu.memory_space<vmem>>, %arg3: memref<1x128xf32, #tpu.memory_space<vmem>>, %arg4: memref<8x32xbf16, #tpu.memory_space<vmem>>, %arg5: memref<32x128xbf16, #tpu.memory_space<vmem>>, %arg6: memref<1x128xf32, #tpu.memory_space<vmem>>, %arg7: memref<128x128xbf16, #tpu.memory_space<vmem>>, %arg8: memref<1x128xf32, #tpu.memory_space<vmem>>, %arg9: memref<8x128xf32, #tpu.memory_space<vmem>>, %arg10: memref<8x128xf32, #tpu.memory_space<vmem>>) attributes {dimension_semantics = [#tpu.dimension_semantics<arbitrary>], iteration_bounds = array<i64: 2>, scalar_prefetch = 0 : i64, scratch_operands = 1 : i64, tpu.core_type = #tpu.core_type<tc>, window_params = [{transform_indices = @transform_0, window_bounds = array<i64: 8, 128, 36>}, {pipeline_mode = #tpu.pipeline_mode<synchronous>, transform_indices = @transform_1, window_bounds = array<i64: 36, 128>}, {pipeline_mode = #tpu.pipeline_mode<synchronous>, transform_indices = @transform_2, window_bounds = array<i64: 1, 128>}, {pipeline_mode = #tpu.pipeline_mode<synchronous>, transform_indices = @transform_3, window_bounds = array<i64: 8, 32>}, {pipeline_mode = #tpu.pipeline_mode<synchronous>, transform_indices = @transform_4, window_bounds = array<i64: 32, 128>}, {pipeline_mode = #tpu.pipeline_mode<synchronous>, transform_indices = @transform_5, window_bounds = array<i64: 1, 128>}, {pipeline_mode = #tpu.pipeline_mode<synchronous>, transform_indices = @transform_6, window_bounds = array<i64: 128, 128>}, {pipeline_mode = #tpu.pipeline_mode<synchronous>, transform_indices = @transform_7, window_bounds = array<i64: 1, 128>}, {pipeline_mode = #tpu.pipeline_mode<synchronous>, transform_indices = @transform_8, window_bounds = array<i64: 8, 128>}]} {
    %c0_i32 = arith.constant 0 : i32
    %0 = arith.cmpi eq, %arg0, %c0_i32 : i32
    %1 = arith.extui %0 : i1 to i32
    %c0_i32_0 = arith.constant 0 : i32
    %2 = arith.cmpi ne, %1, %c0_i32_0 : i32
    scf.if %2 {
      %cst_49 = arith.constant 0.000000e+00 : f32
      %84 = vector.broadcast %cst_49 : f32 to vector<8x128xf32>
      %c0_50 = arith.constant 0 : index
      %c0_51 = arith.constant 0 : index
      %85 = vector.load %arg10[%c0_50, %c0_51] : memref<8x128xf32, #tpu.memory_space<vmem>>, vector<8x128xf32>
      tpu.vector_store %arg10[%c0_50, %c0_51], %84 {strides = array<i32>} : memref<8x128xf32, #tpu.memory_space<vmem>>, vector<8x128xf32>,
    } else {
    }
    %c0 = arith.constant 0 : index
    %c0_1 = arith.constant 0 : index
    %3 = vector.load %arg2[%c0, %c0_1] : memref<36x128xbf16, #tpu.memory_space<vmem>>, vector<36x128xbf16>
    %c0_2 = arith.constant 0 : index
    %c0_3 = arith.constant 0 : index
    %4 = vector.load %arg3[%c0_2, %c0_3] : memref<1x128xf32, #tpu.memory_space<vmem>>, vector<1x128xf32>
    %c0_4 = arith.constant 0 : index
    %c0_5 = arith.constant 0 : index
    %c0_6 = arith.constant 0 : index
    %5 = vector.load %arg1[%c0_4, %c0_5, %c0_6] : memref<8x128x36xbf16, #tpu.memory_space<vmem>>, vector<1x128x36xbf16>
    %6 = vector.shape_cast %5 : vector<1x128x36xbf16> to vector<128x36xbf16>
    %cst = arith.constant dense<0.000000e+00> : vector<128x128xf32>
    %7 = tpu.matmul %6, %3, %cst {dimension_numbers = #tpu.dot_dimension_numbers<[1], [0], [0], [1], [0, 0, 1, 1], [], []>} : vector<128x36xbf16>, vector<36x128xbf16>, vector<128x128xf32> -> vector<128x128xf32>
    %8 = vector.broadcast %4 : vector<1x128xf32> to vector<128x128xf32>
    %9 = arith.addf %7, %8 : vector<128x128xf32>
    %cst_7 = arith.constant 0.000000e+00 : f32
    %10 = vector.broadcast %cst_7 : f32 to vector<128x128xf32>
    %11 = arith.maximumf %9, %10 : vector<128x128xf32>
    %cst_8 = arith.constant dense<0.000000e+00> : vector<128xf32>
    %12 = vector.multi_reduction <add>, %11, %cst_8 [0] : vector<128x128xf32> to vector<128xf32>
    %13 = vector.shape_cast %12 : vector<128xf32> to vector<1x128xf32>
    %c1 = arith.constant 1 : index
    %c0_9 = arith.constant 0 : index
    %c0_10 = arith.constant 0 : index
    %14 = vector.load %arg1[%c1, %c0_9, %c0_10] : memref<8x128x36xbf16, #tpu.memory_space<vmem>>, vector<1x128x36xbf16>
    %15 = vector.shape_cast %14 : vector<1x128x36xbf16> to vector<128x36xbf16>
    %cst_11 = arith.constant dense<0.000000e+00> : vector<128x128xf32>
    %16 = tpu.matmul %15, %3, %cst_11 {dimension_numbers = #tpu.dot_dimension_numbers<[1], [0], [0], [1], [0, 0, 1, 1], [], []>} : vector<128x36xbf16>, vector<36x128xbf16>, vector<128x128xf32> -> vector<128x128xf32>
    %17 = vector.broadcast %4 : vector<1x128xf32> to vector<128x128xf32>
    %18 = arith.addf %16, %17 : vector<128x128xf32>
    %cst_12 = arith.constant 0.000000e+00 : f32
    %19 = vector.broadcast %cst_12 : f32 to vector<128x128xf32>
    %20 = arith.maximumf %18, %19 : vector<128x128xf32>
    %cst_13 = arith.constant dense<0.000000e+00> : vector<128xf32>
    %21 = vector.multi_reduction <add>, %20, %cst_13 [0] : vector<128x128xf32> to vector<128xf32>
    %22 = vector.shape_cast %21 : vector<128xf32> to vector<1x128xf32>
    %c2 = arith.constant 2 : index
    %c0_14 = arith.constant 0 : index
    %c0_15 = arith.constant 0 : index
    %23 = vector.load %arg1[%c2, %c0_14, %c0_15] : memref<8x128x36xbf16, #tpu.memory_space<vmem>>, vector<1x128x36xbf16>
    %24 = vector.shape_cast %23 : vector<1x128x36xbf16> to vector<128x36xbf16>
    %cst_16 = arith.constant dense<0.000000e+00> : vector<128x128xf32>
    %25 = tpu.matmul %24, %3, %cst_16 {dimension_numbers = #tpu.dot_dimension_numbers<[1], [0], [0], [1], [0, 0, 1, 1], [], []>} : vector<128x36xbf16>, vector<36x128xbf16>, vector<128x128xf32> -> vector<128x128xf32>
    %26 = vector.broadcast %4 : vector<1x128xf32> to vector<128x128xf32>
    %27 = arith.addf %25, %26 : vector<128x128xf32>
    %cst_17 = arith.constant 0.000000e+00 : f32
    %28 = vector.broadcast %cst_17 : f32 to vector<128x128xf32>
    %29 = arith.maximumf %27, %28 : vector<128x128xf32>
    %cst_18 = arith.constant dense<0.000000e+00> : vector<128xf32>
    %30 = vector.multi_reduction <add>, %29, %cst_18 [0] : vector<128x128xf32> to vector<128xf32>
    %31 = vector.shape_cast %30 : vector<128xf32> to vector<1x128xf32>
    %c3 = arith.constant 3 : index
    %c0_19 = arith.constant 0 : index
    %c0_20 = arith.constant 0 : index
    %32 = vector.load %arg1[%c3, %c0_19, %c0_20] : memref<8x128x36xbf16, #tpu.memory_space<vmem>>, vector<1x128x36xbf16>
    %33 = vector.shape_cast %32 : vector<1x128x36xbf16> to vector<128x36xbf16>
    %cst_21 = arith.constant dense<0.000000e+00> : vector<128x128xf32>
    %34 = tpu.matmul %33, %3, %cst_21 {dimension_numbers = #tpu.dot_dimension_numbers<[1], [0], [0], [1], [0, 0, 1, 1], [], []>} : vector<128x36xbf16>, vector<36x128xbf16>, vector<128x128xf32> -> vector<128x128xf32>
    %35 = vector.broadcast %4 : vector<1x128xf32> to vector<128x128xf32>
    %36 = arith.addf %34, %35 : vector<128x128xf32>
    %cst_22 = arith.constant 0.000000e+00 : f32
    %37 = vector.broadcast %cst_22 : f32 to vector<128x128xf32>
    %38 = arith.maximumf %36, %37 : vector<128x128xf32>
    %cst_23 = arith.constant dense<0.000000e+00> : vector<128xf32>
    %39 = vector.multi_reduction <add>, %38, %cst_23 [0] : vector<128x128xf32> to vector<128xf32>
    %40 = vector.shape_cast %39 : vector<128xf32> to vector<1x128xf32>
    %c4 = arith.constant 4 : index
    %c0_24 = arith.constant 0 : index
    %c0_25 = arith.constant 0 : index
    %41 = vector.load %arg1[%c4, %c0_24, %c0_25] : memref<8x128x36xbf16, #tpu.memory_space<vmem>>, vector<1x128x36xbf16>
    %42 = vector.shape_cast %41 : vector<1x128x36xbf16> to vector<128x36xbf16>
    %cst_26 = arith.constant dense<0.000000e+00> : vector<128x128xf32>
    %43 = tpu.matmul %42, %3, %cst_26 {dimension_numbers = #tpu.dot_dimension_numbers<[1], [0], [0], [1], [0, 0, 1, 1], [], []>} : vector<128x36xbf16>, vector<36x128xbf16>, vector<128x128xf32> -> vector<128x128xf32>
    %44 = vector.broadcast %4 : vector<1x128xf32> to vector<128x128xf32>
    %45 = arith.addf %43, %44 : vector<128x128xf32>
    %cst_27 = arith.constant 0.000000e+00 : f32
    %46 = vector.broadcast %cst_27 : f32 to vector<128x128xf32>
    %47 = arith.maximumf %45, %46 : vector<128x128xf32>
    %cst_28 = arith.constant dense<0.000000e+00> : vector<128xf32>
    %48 = vector.multi_reduction <add>, %47, %cst_28 [0] : vector<128x128xf32> to vector<128xf32>
    %49 = vector.shape_cast %48 : vector<128xf32> to vector<1x128xf32>
    %c5 = arith.constant 5 : index
    %c0_29 = arith.constant 0 : index
    %c0_30 = arith.constant 0 : index
    %50 = vector.load %arg1[%c5, %c0_29, %c0_30] : memref<8x128x36xbf16, #tpu.memory_space<vmem>>, vector<1x128x36xbf16>
    %51 = vector.shape_cast %50 : vector<1x128x36xbf16> to vector<128x36xbf16>
    %cst_31 = arith.constant dense<0.000000e+00> : vector<128x128xf32>
    %52 = tpu.matmul %51, %3, %cst_31 {dimension_numbers = #tpu.dot_dimension_numbers<[1], [0], [0], [1], [0, 0, 1, 1], [], []>} : vector<128x36xbf16>, vector<36x128xbf16>, vector<128x128xf32> -> vector<128x128xf32>
    %53 = vector.broadcast %4 : vector<1x128xf32> to vector<128x128xf32>
    %54 = arith.addf %52, %53 : vector<128x128xf32>
    %cst_32 = arith.constant 0.000000e+00 : f32
    %55 = vector.broadcast %cst_32 : f32 to vector<128x128xf32>
    %56 = arith.maximumf %54, %55 : vector<128x128xf32>
    %cst_33 = arith.constant dense<0.000000e+00> : vector<128xf32>
    %57 = vector.multi_reduction <add>, %56, %cst_33 [0] : vector<128x128xf32> to vector<128xf32>
    %58 = vector.shape_cast %57 : vector<128xf32> to vector<1x128xf32>
    %c6 = arith.constant 6 : index
    %c0_34 = arith.constant 0 : index
    %c0_35 = arith.constant 0 : index
    %59 = vector.load %arg1[%c6, %c0_34, %c0_35] : memref<8x128x36xbf16, #tpu.memory_space<vmem>>, vector<1x128x36xbf16>
    %60 = vector.shape_cast %59 : vector<1x128x36xbf16> to vector<128x36xbf16>
    %cst_36 = arith.constant dense<0.000000e+00> : vector<128x128xf32>
    %61 = tpu.matmul %60, %3, %cst_36 {dimension_numbers = #tpu.dot_dimension_numbers<[1], [0], [0], [1], [0, 0, 1, 1], [], []>} : vector<128x36xbf16>, vector<36x128xbf16>, vector<128x128xf32> -> vector<128x128xf32>
    %62 = vector.broadcast %4 : vector<1x128xf32> to vector<128x128xf32>
    %63 = arith.addf %61, %62 : vector<128x128xf32>
    %cst_37 = arith.constant 0.000000e+00 : f32
    %64 = vector.broadcast %cst_37 : f32 to vector<128x128xf32>
    %65 = arith.maximumf %63, %64 : vector<128x128xf32>
    %cst_38 = arith.constant dense<0.000000e+00> : vector<128xf32>
    %66 = vector.multi_reduction <add>, %65, %cst_38 [0] : vector<128x128xf32> to vector<128xf32>
    %67 = vector.shape_cast %66 : vector<128xf32> to vector<1x128xf32>
    %c7 = arith.constant 7 : index
    %c0_39 = arith.constant 0 : index
    %c0_40 = arith.constant 0 : index
    %68 = vector.load %arg1[%c7, %c0_39, %c0_40] : memref<8x128x36xbf16, #tpu.memory_space<vmem>>, vector<1x128x36xbf16>
    %69 = vector.shape_cast %68 : vector<1x128x36xbf16> to vector<128x36xbf16>
    %cst_41 = arith.constant dense<0.000000e+00> : vector<128x128xf32>
    %70 = tpu.matmul %69, %3, %cst_41 {dimension_numbers = #tpu.dot_dimension_numbers<[1], [0], [0], [1], [0, 0, 1, 1], [], []>} : vector<128x36xbf16>, vector<36x128xbf16>, vector<128x128xf32> -> vector<128x128xf32>
    %71 = vector.broadcast %4 : vector<1x128xf32> to vector<128x128xf32>
    %72 = arith.addf %70, %71 : vector<128x128xf32>
    %cst_42 = arith.constant 0.000000e+00 : f32
    %73 = vector.broadcast %cst_42 : f32 to vector<128x128xf32>
    %74 = arith.maximumf %72, %73 : vector<128x128xf32>
    %cst_43 = arith.constant dense<0.000000e+00> : vector<128xf32>
    %75 = vector.multi_reduction <add>, %74, %cst_43 [0] : vector<128x128xf32> to vector<128xf32>
    %76 = vector.shape_cast %75 : vector<128xf32> to vector<1x128xf32>
    %c0_44 = arith.constant 0 : index
    %c0_45 = arith.constant 0 : index
    %77 = vector.load %arg10[%c0_44, %c0_45] : memref<8x128xf32, #tpu.memory_space<vmem>>, vector<8x128xf32>
    %78 = tpu.concatenate %13, %22, %31, %40, %49, %58, %67, %76 in 0 : vector<1x128xf32>, vector<1x128xf32>, vector<1x128xf32>, vector<1x128xf32>, vector<1x128xf32>, vector<1x128xf32>, vector<1x128xf32>, vector<1x128xf32> -> vector<8x128xf32>
    %79 = arith.addf %77, %78 : vector<8x128xf32>
    %c0_46 = arith.constant 0 : index
    %c0_47 = arith.constant 0 : index
    %80 = vector.load %arg10[%c0_46, %c0_47] : memref<8x128xf32, #tpu.memory_space<vmem>>, vector<8x128xf32>
    tpu.vector_store %arg10[%c0_46, %c0_47], %79 {strides = array<i32>} : memref<8x128xf32, #tpu.memory_space<vmem>>, vector<8x128xf32>,
    %c1_i32 = arith.constant 1 : i32
    %81 = arith.cmpi eq, %arg0, %c1_i32 : i32
    %82 = arith.extui %81 : i1 to i32
    %c0_i32_48 = arith.constant 0 : i32
    %83 = arith.cmpi ne, %82, %c0_i32_48 : i32
    scf.if %83 {
      %c0_49 = arith.constant 0 : index
      %c0_50 = arith.constant 0 : index
      %84 = vector.load %arg10[%c0_49, %c0_50] : memref<8x128xf32, #tpu.memory_space<vmem>>, vector<8x128xf32>
      %cst_51 = arith.constant 3.906250e-03 : f32
      %85 = vector.broadcast %cst_51 : f32 to vector<8x128xf32>
      %86 = arith.mulf %84, %85 : vector<8x128xf32>
      %c0_52 = arith.constant 0 : index
      %c0_53 = arith.constant 0 : index
      %87 = vector.load %arg4[%c0_52, %c0_53] : memref<8x32xbf16, #tpu.memory_space<vmem>>, vector<8x32xbf16>
      %c0_54 = arith.constant 0 : index
      %c0_55 = arith.constant 0 : index
      %88 = vector.load %arg5[%c0_54, %c0_55] : memref<32x128xbf16, #tpu.memory_space<vmem>>, vector<32x128xbf16>
      %cst_56 = arith.constant dense<0.000000e+00> : vector<8x128xf32>
      %89 = tpu.matmul %87, %88, %cst_56 {dimension_numbers = #tpu.dot_dimension_numbers<[1], [0], [0], [1], [0, 0, 1, 1], [], []>} : vector<8x32xbf16>, vector<32x128xbf16>, vector<8x128xf32> -> vector<8x128xf32>
      %c0_57 = arith.constant 0 : index
      %c0_58 = arith.constant 0 : index
      %90 = vector.load %arg6[%c0_57, %c0_58] : memref<1x128xf32, #tpu.memory_space<vmem>>, vector<1x128xf32>
      %91 = vector.broadcast %90 : vector<1x128xf32> to vector<8x128xf32>
      %92 = arith.addf %89, %91 : vector<8x128xf32>
      %93 = math.tanh %92 : vector<8x128xf32>
      %94 = arith.mulf %86, %93 : vector<8x128xf32>
      %95 = arith.truncf %94 : vector<8x128xf32> to vector<8x128xbf16>
      %c0_59 = arith.constant 0 : index
      %c0_60 = arith.constant 0 : index
      %96 = vector.load %arg7[%c0_59, %c0_60] : memref<128x128xbf16, #tpu.memory_space<vmem>>, vector<128x128xbf16>
      %cst_61 = arith.constant dense<0.000000e+00> : vector<8x128xf32>
      %97 = tpu.matmul %95, %96, %cst_61 {dimension_numbers = #tpu.dot_dimension_numbers<[1], [0], [0], [1], [0, 0, 1, 1], [], []>} : vector<8x128xbf16>, vector<128x128xbf16>, vector<8x128xf32> -> vector<8x128xf32>
      %c0_62 = arith.constant 0 : index
      %c0_63 = arith.constant 0 : index
      %98 = vector.load %arg8[%c0_62, %c0_63] : memref<1x128xf32, #tpu.memory_space<vmem>>, vector<1x128xf32>
      %99 = vector.broadcast %98 : vector<1x128xf32> to vector<8x128xf32>
      %100 = arith.addf %97, %99 : vector<8x128xf32>
      %c0_64 = arith.constant 0 : index
      %c0_65 = arith.constant 0 : index
      %101 = vector.load %arg9[%c0_64, %c0_65] : memref<8x128xf32, #tpu.memory_space<vmem>>, vector<8x128xf32>
      tpu.vector_store %arg9[%c0_64, %c0_65], %100 {strides = array<i32>} : memref<8x128xf32, #tpu.memory_space<vmem>>, vector<8x128xf32>,
    } else {
    }
    return
  }
  func.func @transform_0(%arg0: i32) -> (i32, i32, i32) {
    %c0_i32 = arith.constant 0 : i32
    %c0_i32_0 = arith.constant 0 : i32
    %c0_i32_1 = arith.constant 0 : i32
    return %c0_i32, %arg0, %c0_i32_0 : i32, i32, i32
  }
  func.func @transform_1(%arg0: i32) -> (i32, i32) {
    %c0_i32 = arith.constant 0 : i32
    %c0_i32_0 = arith.constant 0 : i32
    %c0_i32_1 = arith.constant 0 : i32
    return %c0_i32, %c0_i32_0 : i32, i32
  }
  func.func @transform_2(%arg0: i32) -> (i32, i32) {
    %c0_i32 = arith.constant 0 : i32
    %c0_i32_0 = arith.constant 0 : i32
    %c0_i32_1 = arith.constant 0 : i32
    return %c0_i32, %c0_i32_0 : i32, i32
  }
  func.func @transform_3(%arg0: i32) -> (i32, i32) {
    %c0_i32 = arith.constant 0 : i32
    %c0_i32_0 = arith.constant 0 : i32
    %c0_i32_1 = arith.constant 0 : i32
    return %c0_i32, %c0_i32_0 : i32, i32
  }
  func.func @transform_4(%arg0: i32) -> (i32, i32) {
    %c0_i32 = arith.constant 0 : i32
    %c0_i32_0 = arith.constant 0 : i32
    %c0_i32_1 = arith.constant 0 : i32
    return %c0_i32, %c0_i32_0 : i32, i32
  }
  func.func @transform_5(%arg0: i32) -> (i32, i32) {
    %c0_i32 = arith.constant 0 : i32
    %c0_i32_0 = arith.constant 0 : i32
    %c0_i32_1 = arith.constant 0 : i32
    return %c0_i32, %c0_i32_0 : i32, i32
  }
  func.func @transform_6(%arg0: i32) -> (i32, i32) {
    %c0_i32 = arith.constant 0 : i32
    %c0_i32_0 = arith.constant 0 : i32
    %c0_i32_1 = arith.constant 0 : i32
    return %c0_i32, %c0_i32_0 : i32, i32
  }
  func.func @transform_7(%arg0: i32) -> (i32, i32) {
    %c0_i32 = arith.constant 0 : i32
    %c0_i32_0 = arith.constant 0 : i32
    %c0_i32_1 = arith.constant 0 : i32
    return %c0_i32, %c0_i32_0 : i32, i32
  }
  func.func @transform_8(%arg0: i32) -> (i32, i32) {
    %c0_i32 = arith.constant 0 : i32
    %c0_i32_0 = arith.constant 0 : i32
    %c0_i32_1 = arith.constant 0 : i32
    return %c0_i32, %c0_i32_0 : i32, i32
  }
}

</mosaic_0001>

<bundles_post_ra>
// kernel: tpu_custom_call.1
= control target key start
LH: loop header
LB: loop body
LE: loop exit
PB: predicated region body
PF: predicated region fallthrough
CT: control target
= control target key end

     0   :  { %13 = vsyncpa [#allocation5], 0  ;;  %s3658_s27 = smov 0   ;;  %s3660_s28 = smov 0   ;;  %s4250_s0 = inlined_call_operand.vmem [shape: bf16[8,256,36], index: 0, kind: input, shape index: {}]   ;;  %s4251_s1 = inlined_call_operand.vmem [shape: bf16[36,128], index: 1, kind: input, shape index: {}]   ;;  %s4252_s2 = inlined_call_operand.vmem [shape: f32[1,128], index: 2, kind: input, shape index: {}]   ;;  %s4253_s3 = inlined_call_operand.vmem [shape: bf16[8,32], index: 3, kind: input, shape index: {}]   ;;  %s4254_s4 = inlined_call_operand.vmem [shape: bf16[32,128], index: 4, kind: input, shape index: {}]   ;;  %s4255_s5 = inlined_call_operand.vmem [shape: f32[1,128], index: 5, kind: input, shape index: {}]   ;;  %s4256_s6 = inlined_call_operand.vmem [shape: bf16[128,128], index: 6, kind: input, shape index: {}]   ;;  %s4257_s7 = inlined_call_operand.vmem [shape: f32[1,128], index: 7, kind: input, shape index: {}]   ;;  %s4258_s8 = inlined_call_operand.hbm [shape: f32[8,128], index: 8, kind: output, shape index: {}]  }
   0x1   :  { %s3662_s29 = smov 0  }
   0x2 LB: > { %s3674_s30 = sadd.s32 4294967295, %s3607_s29   ;;  %s3677_s9 = sadd.s32 1, %s3607_s29   ;;  %s3607_s29 = sphi %s3662_s29, %s4261_s29   ;;  %s3603_s28 = sphi %s3660_s28, %s4260_s28   ;;  %s3599_s27 = sphi %s3658_s27, %s4259_s27  }
   0x3   : > { %s23_s10 = ssub.s32 %s3607_s29, %s3677_s9  ;;  %s26_s11 = sadd.s32 1, %s3603_s28 }
   0x4   : > { %p24_p0 = scmp.eq.s32.totalorder %s23_s10, 0  ;;  %p33_p1 = scmp.ne.s32.totalorder %s3603_s28, %s3599_s27 }
   0x5   : > { %p34_p2 = scmp.eq.s32.totalorder %s3607_s29, 0  ;;  %p2859_p4 = scmp.ge.s32.totalorder %s3607_s29, 2 }
   0x6   : > { %s3686_s12 = scalar_select %p24_p0, %s3603_s28, %s26_s11  }
   0x7   : > { %p35_p3 = por %p34_p2, %p33_p1  ;;  %248 = sbr.rel (%p2859_p4) target bundleno = 50 (0x32), region = 44 }
   0xe   : > { %251 = sbr.rel (!%p35_p3) target bundleno = 50 (0x32), region = 48  ;;  %s253_s13 = sand.u32 (%p35_p3), 1, %s3603_s28  }
   0xf   : > { %s3128_s14 = sshll.u32 (%p35_p3), %s3607_s29, 6  ;;  %s2860_s15 = sshll.u32 (%p35_p3), %s253_s13, 9 }
  0x10   : > { %s3694_s18 = scalar_lea.vmem (%p35_p3), %s4250_s0, %s3128_s14  ;;  %s3699_s19 = scalar_lea.vmem (%p35_p3), [#allocation3], %s2860_s15 }
  0x11   : > { %v274_v0 = vld [vmem:[%s3694_s18] sm:$0xff] (%p35_p3)   ;;  %v278_v1 = vld [vmem:[%s3694_s18 + $0x8] sm:$0xff] (%p35_p3)   ;;  %v282_v2 = vld [vmem:[%s3694_s18 + $0x10] sm:$0xff] (%p35_p3)  }
  0x12   : > { %275 = vst [vmem:[%s3699_s19] sm:$0xff] (%p35_p3), %v274_v0   ;;  %279 = vst [vmem:[%s3699_s19 + $0x8] sm:$0xff] (%p35_p3), %v278_v1   ;;  %v286_v3 = vld [vmem:[%s3694_s18 + $0x18] sm:$0xff] (%p35_p3)   ;;  %v290_v4 = vld [vmem:[%s3694_s18 + $0x20] sm:$0xff] (%p35_p3)  }
  0x13   : > { %283 = vst [vmem:[%s3699_s19 + $0x10] sm:$0xff] (%p35_p3), %v282_v2   ;;  %v294_v5 = vld [vmem:[%s3694_s18 + $0x28] sm:$0xff] (%p35_p3)   ;;  %287 = vst [vmem:[%s3699_s19 + $0x18] sm:$0xff] (%p35_p3), %v286_v3   ;;  %v298_v6 = vld [vmem:[%s3694_s18 + $0x30] sm:$0xff] (%p35_p3)  }
  0x14   : > { %291 = vst [vmem:[%s3699_s19 + $0x20] sm:$0xff] (%p35_p3), %v290_v4   ;;  %295 = vst [vmem:[%s3699_s19 + $0x28] sm:$0xff] (%p35_p3), %v294_v5   ;;  %v302_v7 = vld [vmem:[%s3694_s18 + $0x38] sm:$0xff] (%p35_p3)   ;;  %v306_v8 = vld [vmem:[%s3694_s18 + $0x80] sm:$0xff] (%p35_p3)  }
  0x15   : > { %299 = vst [vmem:[%s3699_s19 + $0x30] sm:$0xff] %v298_v6   ;;  %303 = vst [vmem:[%s3699_s19 + $0x38] sm:$0xff] %v302_v7   ;;  %v310_v9 = vld [vmem:[%s3694_s18 + $0x88] sm:$0xff]   ;;  %v314_v10 = vld [vmem:[%s3694_s18 + $0x90] sm:$0xff]  }
  0x16   : > { %307 = vst [vmem:[%s3699_s19 + $0x40] sm:$0xff] %v306_v8   ;;  %v318_v11 = vld [vmem:[%s3694_s18 + $0x98] sm:$0xff]   ;;  %311 = vst [vmem:[%s3699_s19 + $0x48] sm:$0xff] %v310_v9   ;;  %v322_v12 = vld [vmem:[%s3694_s18 + $0xa0] sm:$0xff]  }
  0x17   : > { %315 = vst [vmem:[%s3699_s19 + $0x50] sm:$0xff] %v314_v10   ;;  %319 = vst [vmem:[%s3699_s19 + $0x58] sm:$0xff] %v318_v11   ;;  %v326_v13 = vld [vmem:[%s3694_s18 + $0xa8] sm:$0xff]   ;;  %v330_v14 = vld [vmem:[%s3694_s18 + $0xb0] sm:$0xff]  }
  0x18   : > { %323 = vst [vmem:[%s3699_s19 + $0x60] sm:$0xff] %v322_v12   ;;  %327 = vst [vmem:[%s3699_s19 + $0x68] sm:$0xff] %v326_v13   ;;  %v334_v15 = vld [vmem:[%s3694_s18 + $0xb8] sm:$0xff]   ;;  %v338_v16 = vld [vmem:[%s3694_s18 + $0x100] sm:$0xff]  }
  0x19   : > { %331 = vst [vmem:[%s3699_s19 + $0x70] sm:$0xff] %v330_v14   ;;  %v342_v17 = vld [vmem:[%s3694_s18 + $0x108] sm:$0xff]   ;;  %335 = vst [vmem:[%s3699_s19 + $0x78] sm:$0xff] %v334_v15   ;;  %v346_v18 = vld [vmem:[%s3694_s18 + $0x110] sm:$0xff]  }
  0x1a   : > { %339 = vst [vmem:[%s3699_s19 + $0x80] sm:$0xff] %v338_v16   ;;  %343 = vst [vmem:[%s3699_s19 + $0x88] sm:$0xff] %v342_v17   ;;  %v350_v19 = vld [vmem:[%s3694_s18 + $0x118] sm:$0xff]   ;;  %v354_v20 = vld [vmem:[%s3694_s18 + $0x120] sm:$0xff]  }
  0x1b   : > { %347 = vst [vmem:[%s3699_s19 + $0x90] sm:$0xff] %v346_v18   ;;  %351 = vst [vmem:[%s3699_s19 + $0x98] sm:$0xff] %v350_v19   ;;  %v358_v21 = vld [vmem:[%s3694_s18 + $0x128] sm:$0xff]   ;;  %v362_v22 = vld [vmem:[%s3694_s18 + $0x130] sm:$0xff]  }
  0x1c   : > { %355 = vst [vmem:[%s3699_s19 + $0xa0] sm:$0xff] %v354_v20   ;;  %v366_v23 = vld [vmem:[%s3694_s18 + $0x138] sm:$0xff]   ;;  %359 = vst [vmem:[%s3699_s19 + $0xa8] sm:$0xff] %v358_v21   ;;  %v370_v24 = vld [vmem:[%s3694_s18 + $0x180] sm:$0xff]  }
  0x1d   : > { %363 = vst [vmem:[%s3699_s19 + $0xb0] sm:$0xff] %v362_v22   ;;  %367 = vst [vmem:[%s3699_s19 + $0xb8] sm:$0xff] %v366_v23   ;;  %v374_v25 = vld [vmem:[%s3694_s18 + $0x188] sm:$0xff]   ;;  %v378_v26 = vld [vmem:[%s3694_s18 + $0x190] sm:$0xff]  }
  0x1e   : > { %371 = vst [vmem:[%s3699_s19 + $0xc0] sm:$0xff] %v370_v24   ;;  %375 = vst [vmem:[%s3699_s19 + $0xc8] sm:$0xff] %v374_v25   ;;  %v382_v27 = vld [vmem:[%s3694_s18 + $0x198] sm:$0xff]   ;;  %v386_v28 = vld [vmem:[%s3694_s18 + $0x1a0] sm:$0xff]  }
  0x1f   : > { %379 = vst [vmem:[%s3699_s19 + $0xd0] sm:$0xff] %v378_v26   ;;  %v390_v29 = vld [vmem:[%s3694_s18 + $0x1a8] sm:$0xff]   ;;  %383 = vst [vmem:[%s3699_s19 + $0xd8] sm:$0xff] %v382_v27   ;;  %v394_v30 = vld [vmem:[%s3694_s18 + $0x1b0] sm:$0xff]  }
  0x20   : > { %387 = vst [vmem:[%s3699_s19 + $0xe0] sm:$0xff] %v386_v28   ;;  %391 = vst [vmem:[%s3699_s19 + $0xe8] sm:$0xff] %v390_v29   ;;  %v398_v31 = vld [vmem:[%s3694_s18 + $0x1b8] sm:$0xff]   ;;  %v402_v32 = vld [vmem:[%s3694_s18 + $0x200] sm:$0xff]  }
  0x21   : > { %395 = vst [vmem:[%s3699_s19 + $0xf0] sm:$0xff] %v394_v30   ;;  %399 = vst [vmem:[%s3699_s19 + $0xf8] sm:$0xff] %v398_v31   ;;  %v406_v33 = vld [vmem:[%s3694_s18 + $0x208] sm:$0xff]   ;;  %v410_v34 = vld [vmem:[%s3694_s18 + $0x210] sm:$0xff]  }
  0x22   : > { %403 = vst [vmem:[%s3699_s19 + $0x100] sm:$0xff] %v402_v32   ;;  %v414_v35 = vld [vmem:[%s3694_s18 + $0x218] sm:$0xff]   ;;  %407 = vst [vmem:[%s3699_s19 + $0x108] sm:$0xff] %v406_v33   ;;  %v418_v36 = vld [vmem:[%s3694_s18 + $0x220] sm:$0xff]  }
  0x23   : > { %411 = vst [vmem:[%s3699_s19 + $0x110] sm:$0xff] %v410_v34   ;;  %415 = vst [vmem:[%s3699_s19 + $0x118] sm:$0xff] %v414_v35   ;;  %v422_v37 = vld [vmem:[%s3694_s18 + $0x228] sm:$0xff]   ;;  %v426_v38 = vld [vmem:[%s3694_s18 + $0x230] sm:$0xff]  }
  0x24   : > { %419 = vst [vmem:[%s3699_s19 + $0x120] sm:$0xff] %v418_v36   ;;  %423 = vst [vmem:[%s3699_s19 + $0x128] sm:$0xff] %v422_v37   ;;  %v430_v39 = vld [vmem:[%s3694_s18 + $0x238] sm:$0xff]   ;;  %v434_v40 = vld [vmem:[%s3694_s18 + $0x280] sm:$0xff]  }
  0x25   : > { %427 = vst [vmem:[%s3699_s19 + $0x130] sm:$0xff] %v426_v38   ;;  %v438_v41 = vld [vmem:[%s3694_s18 + $0x288] sm:$0xff]   ;;  %431 = vst [vmem:[%s3699_s19 + $0x138] sm:$0xff] %v430_v39   ;;  %v442_v42 = vld [vmem:[%s3694_s18 + $0x290] sm:$0xff]  }
  0x26   : > { %435 = vst [vmem:[%s3699_s19 + $0x140] sm:$0xff] %v434_v40   ;;  %439 = vst [vmem:[%s3699_s19 + $0x148] sm:$0xff] %v438_v41   ;;  %v446_v43 = vld [vmem:[%s3694_s18 + $0x298] sm:$0xff]   ;;  %v450_v44 = vld [vmem:[%s3694_s18 + $0x2a0] sm:$0xff]  }
  0x27   : > { %443 = vst [vmem:[%s3699_s19 + $0x150] sm:$0xff] %v442_v42   ;;  %447 = vst [vmem:[%s3699_s19 + $0x158] sm:$0xff] %v446_v43   ;;  %v454_v45 = vld [vmem:[%s3694_s18 + $0x2a8] sm:$0xff]   ;;  %v458_v46 = vld [vmem:[%s3694_s18 + $0x2b0] sm:$0xff]  }
  0x28   : > { %451 = vst [vmem:[%s3699_s19 + $0x160] sm:$0xff] %v450_v44   ;;  %v462_v47 = vld [vmem:[%s3694_s18 + $0x2b8] sm:$0xff]   ;;  %455 = vst [vmem:[%s3699_s19 + $0x168] sm:$0xff] %v454_v45   ;;  %v466_v48 = vld [vmem:[%s3694_s18 + $0x300] sm:$0xff]  }
  0x29   : > { %459 = vst [vmem:[%s3699_s19 + $0x170] sm:$0xff] %v458_v46   ;;  %463 = vst [vmem:[%s3699_s19 + $0x178] sm:$0xff] %v462_v47   ;;  %v470_v49 = vld [vmem:[%s3694_s18 + $0x308] sm:$0xff]   ;;  %v474_v50 = vld [vmem:[%s3694_s18 + $0x310] sm:$0xff]  }
  0x2a   : > { %467 = vst [vmem:[%s3699_s19 + $0x180] sm:$0xff] %v466_v48   ;;  %471 = vst [vmem:[%s3699_s19 + $0x188] sm:$0xff] %v470_v49   ;;  %v478_v51 = vld [vmem:[%s3694_s18 + $0x318] sm:$0xff]   ;;  %v482_v52 = vld [vmem:[%s3694_s18 + $0x320] sm:$0xff]  }
  0x2b   : > { %475 = vst [vmem:[%s3699_s19 + $0x190] sm:$0xff] %v474_v50   ;;  %v486_v53 = vld [vmem:[%s3694_s18 + $0x328] sm:$0xff]   ;;  %479 = vst [vmem:[%s3699_s19 + $0x198] sm:$0xff] %v478_v51   ;;  %v490_v54 = vld [vmem:[%s3694_s18 + $0x330] sm:$0xff]  }
  0x2c   : > { %483 = vst [vmem:[%s3699_s19 + $0x1a0] sm:$0xff] %v482_v52   ;;  %487 = vst [vmem:[%s3699_s19 + $0x1a8] sm:$0xff] %v486_v53   ;;  %v494_v55 = vld [vmem:[%s3694_s18 + $0x338] sm:$0xff]   ;;  %v498_v56 = vld [vmem:[%s3694_s18 + $0x380] sm:$0xff]  }
  0x2d   : > { %491 = vst [vmem:[%s3699_s19 + $0x1b0] sm:$0xff] %v490_v54   ;;  %495 = vst [vmem:[%s3699_s19 + $0x1b8] sm:$0xff] %v494_v55   ;;  %v502_v57 = vld [vmem:[%s3694_s18 + $0x388] sm:$0xff]   ;;  %v506_v58 = vld [vmem:[%s3694_s18 + $0x390] sm:$0xff]  }
  0x2e   : > { %499 = vst [vmem:[%s3699_s19 + $0x1c0] sm:$0xff] %v498_v56   ;;  %v510_v59 = vld [vmem:[%s3694_s18 + $0x398] sm:$0xff]   ;;  %503 = vst [vmem:[%s3699_s19 + $0x1c8] sm:$0xff] %v502_v57   ;;  %v514_v60 = vld [vmem:[%s3694_s18 + $0x3a0] sm:$0xff]  }
  0x2f   : > { %507 = vst [vmem:[%s3699_s19 + $0x1d0] sm:$0xff] %v506_v58   ;;  %511 = vst [vmem:[%s3699_s19 + $0x1d8] sm:$0xff] %v510_v59   ;;  %v518_v61 = vld [vmem:[%s3694_s18 + $0x3a8] sm:$0xff]   ;;  %v522_v62 = vld [vmem:[%s3694_s18 + $0x3b0] sm:$0xff]  }
  0x30   : > { %515 = vst [vmem:[%s3699_s19 + $0x1e0] sm:$0xff] %v514_v60   ;;  %519 = vst [vmem:[%s3699_s19 + $0x1e8] sm:$0xff] %v518_v61   ;;  %v526_v63 = vld [vmem:[%s3694_s18 + $0x3b8] sm:$0xff]  }
  0x31   : > { %523 = vst [vmem:[%s3699_s19 + $0x1f0] sm:$0xff] %v522_v62   ;;  %527 = vst [vmem:[%s3699_s19 + $0x1f8] sm:$0xff] %v526_v63  }
  0x32 PF: > { %p2863_p5 = scmp.ge.s32.totalorder %s3607_s29, 1  ;;  %p807_p6 = scmp.lt.s32.totalorder %s3607_s29, 3 }
  0x34   : > { %p808_p7 = pnand %p2863_p5, %p807_p6 }
  0x35   : > { %s814_s20 = sand.u32 (!%p808_p7), 1, %s3599_s27   ;;  %p2865_p8 = scmp.ne.s32.totalorder (!%p808_p7), %s3674_s30, 0 }
  0x36   : > { %811 = sbr.rel (%p808_p7) target bundleno = 892 (0x37c), region = 89  ;;  %s2864_s21 = sshll.u32 (!%p808_p7), %s814_s20, 9 }
  0x37   : > { %s3829_s22 = scalar_lea.vmem (!%p808_p7), [#allocation3], %s2864_s21 }
  0x3d   : > { %847 = sbr.rel (%p2865_p8) target bundleno = 68 (0x44), region = 97  ;;  %v3609_v0 = vmov (!%p2865_p8), 0.0  }
  0x3e   : > { %848 = vst [vmem:[#allocation2] sm:$0xff] (!%p2865_p8), %v3609_v0 }
  0x44 PF: > { %v3835_v1 = vld [vmem:[%s4251_s1] sm:$0xff]   ;;  %v3840_v2 = vld [vmem:[%s4251_s1 + $0x8] sm:$0xff]   ;;  %vm932_vm0 = vcmask 293888   ;;  %v3847_v3 = vld [vmem:[%s4251_s1 + $0x10] ss:$0 sps:$4 sm:$0x33]  }
  0x45   : > { %3229 = vmatprep.subr.bf16.mxu0 %v3835_v1  ;;  %3251 = vmatprep.subr.bf16.mxu1 %v3835_v1  ;;  %v3478_v4 = vld [vmem:[%s3829_s22] sm:$0xff]   ;;  %vm957_vm1 = vcmask 1041408   ;;  %v3480_v7 = vld [vmem:[%s3829_s22 + $0x8] sm:$0xff]   ;;  %v3482_v9 = vld [vmem:[%s3829_s22 + $0x10] sm:$0xff]   ;;  %vm2601_vm2 = vcmask 1040384   ;;  %vm2604_vm3 = vcmask 1042432  }
  0x46   : > { %3230 = vmatpush3.bf16.msra.mxu0 %v3835_v1  ;;  %3252 = vmatpush3.bf16.msra.mxu1 %v3835_v1  ;;  %v3479_v5 = vld [vmem:[%s3829_s22 + $0x40] sm:$0xff]   ;;  %v3865_v6 = vsel %vm957_vm1, %v3847_v3, 0  ;;  %v3481_v8 = vld [vmem:[%s3829_s22 + $0x48] sm:$0xff]   ;;  %v3483_v10 = vld [vmem:[%s3829_s22 + $0x50] sm:$0xff]   ;;  %vm2606_vm4 = vcmask 1043456   ;;  %vm2608_vm5 = vcmask 1044480  }
  0x47   : > { %3231 = vmatprep.subr.bf16.mxu0 %v3840_v2  ;;  %3253 = vmatprep.subr.bf16.mxu1 %v3840_v2  ;;  %v3484_v11 = vld [vmem:[%s3829_s22 + $0x18] sm:$0xff]   ;;  %v3486_v13 = vld [vmem:[%s3829_s22 + $0x20] sm:$0xff]   ;;  %v3488_v15 = vld [vmem:[%s3829_s22 + $0x28] sm:$0xff]   ;;  %vm2610_vm6 = vcmask 1045504   ;;  %vm2612_vm7 = vcmask 1046528   ;;  %p3110_p9 = scmp.ne.s32.totalorder %s3674_s30, 1 }
  0x48   : > { %3235 = vmatprep.mubr.msk.bf16.mxu0 %vm932_vm0, %v3478_v4  ;;  %3257 = vmatprep.mubr.msk.bf16.mxu1 %vm932_vm0, %v3479_v5  ;;  %v3485_v12 = vld [vmem:[%s3829_s22 + $0x58] sm:$0xff]   ;;  %v3487_v14 = vld [vmem:[%s3829_s22 + $0x60] sm:$0xff]   ;;  %v3489_v16 = vld [vmem:[%s3829_s22 + $0x68] sm:$0xff]   ;;  %vm3611_vm8 = vmmov (!%p3110_p9), 0   ;;  %vm2646_vm9 = vcmask (!%p3110_p9), 261120  }
  0x49   : > { %v3490_v17 = vld [vmem:[%s3829_s22 + $0x30] sm:$0xff]   ;;  %v3492_v19 = vld [vmem:[%s3829_s22 + $0x38] sm:$0xff]   ;;  %v3494_v21 = vld [vmem:[%s3829_s22 + $0x80] sm:$0xff]  }
  0x4a   : > { %3232 = vmatpush3.bf16.msra.mxu0 %v3840_v2  ;;  %3254 = vmatpush3.bf16.msra.mxu1 %v3840_v2  ;;  %v3491_v18 = vld [vmem:[%s3829_s22 + $0x70] sm:$0xff]   ;;  %v3493_v20 = vld [vmem:[%s3829_s22 + $0x78] sm:$0xff]   ;;  %v3495_v22 = vld [vmem:[%s3829_s22 + $0xc0] sm:$0xff]  }
  0x4b   : > { %3433 = vmatprep.subr.msk.bf16.mxu0 %vm957_vm1, %v3847_v3  ;;  %3434 = vmatprep.subr.msk.bf16.mxu1 %vm957_vm1, %v3847_v3  ;;  %v3496_v23 = vld [vmem:[%s3829_s22 + $0x88] sm:$0xff]   ;;  %v3498_v25 = vld [vmem:[%s3829_s22 + $0x90] sm:$0xff]   ;;  %v3500_v27 = vld [vmem:[%s3829_s22 + $0x98] sm:$0xff]  }
  0x4c   : > { %v3497_v24 = vld [vmem:[%s3829_s22 + $0xc8] sm:$0xff]   ;;  %v3499_v26 = vld [vmem:[%s3829_s22 + $0xd0] sm:$0xff]   ;;  %v3501_v28 = vld [vmem:[%s3829_s22 + $0xd8] sm:$0xff]  }
  0x4d   : > { %v3502_v29 = vld [vmem:[%s3829_s22 + $0xa0] sm:$0xff]   ;;  %v3504_v31 = vld [vmem:[%s3829_s22 + $0xa8] sm:$0xff]   ;;  %v3506_v33 = vld [vmem:[%s3829_s22 + $0xb0] sm:$0xff]  }
  0x4e   : > { %3234 = vmatpush3.bf16.msra.mxu0 %v3865_v6  ;;  %3256 = vmatpush3.bf16.msra.mxu1 %v3865_v6  ;;  %v3503_v30 = vld [vmem:[%s3829_s22 + $0xe0] sm:$0xff]   ;;  %v3505_v32 = vld [vmem:[%s3829_s22 + $0xe8] sm:$0xff]   ;;  %v3507_v34 = vld [vmem:[%s3829_s22 + $0xf0] sm:$0xff]  }
  0x4f   : > { %3273 = vmatprep.subr.bf16.mxu0 %v3835_v1  ;;  %3295 = vmatprep.subr.bf16.mxu1 %v3835_v1  ;;  %v3508_v35 = vld [vmem:[%s3829_s22 + $0xb8] sm:$0xff]   ;;  %v3510_v37 = vld [vmem:[%s3829_s22 + $0x100] sm:$0xff]   ;;  %v3512_v39 = vld [vmem:[%s3829_s22 + $0x108] sm:$0xff]  }
  0x50   : > { %v3509_v36 = vld [vmem:[%s3829_s22 + $0xf8] sm:$0xff]   ;;  %v3511_v38 = vld [vmem:[%s3829_s22 + $0x140] sm:$0xff]   ;;  %v3513_v40 = vld [vmem:[%s3829_s22 + $0x148] sm:$0xff]  }
  0x51   : > { %3236 = vmatmul.mubr.msk.bf16.vlgmr.msra.gmra.mrb[0].mxu0 %vm932_vm0, %v3480_v7  ;;  %3258 = vmatmul.mubr.msk.bf16.vlgmr.msra.gmra.mrb[0].mxu1 %vm932_vm0, %v3481_v8  ;;  %v3514_v41 = vld [vmem:[%s3829_s22 + $0x110] sm:$0xff]   ;;  %v3516_v43 = vld [vmem:[%s3829_s22 + $0x118] sm:$0xff]   ;;  %v3518_v45 = vld [vmem:[%s3829_s22 + $0x120] sm:$0xff]  }
  0x52   : > { %3274 = vmatpush3.bf16.msra.mxu0 %v3835_v1  ;;  %3296 = vmatpush3.bf16.msra.mxu1 %v3835_v1  ;;  %v3515_v42 = vld [vmem:[%s3829_s22 + $0x150] sm:$0xff]   ;;  %v3517_v44 = vld [vmem:[%s3829_s22 + $0x158] sm:$0xff]   ;;  %v3519_v46 = vld [vmem:[%s3829_s22 + $0x160] sm:$0xff]  }
  0x53   : > { %3239 = vmatprep.mubr.msk.bf16.mxu0 %vm932_vm0, %v3482_v9  ;;  %3261 = vmatprep.mubr.msk.bf16.mxu1 %vm932_vm0, %v3483_v10  ;;  %v3520_v47 = vld [vmem:[%s3829_s22 + $0x128] sm:$0xff]   ;;  %v3522_v49 = vld [vmem:[%s3829_s22 + $0x130] sm:$0xff]   ;;  %v3524_v51 = vld [vmem:[%s3829_s22 + $0x138] sm:$0xff]  }
  0x54   : > { %3275 = vmatprep.subr.bf16.mxu0 %v3840_v2  ;;  %3297 = vmatprep.subr.bf16.mxu1 %v3840_v2  ;;  %v3521_v48 = vld [vmem:[%s3829_s22 + $0x168] sm:$0xff]   ;;  %v3523_v50 = vld [vmem:[%s3829_s22 + $0x170] sm:$0xff]   ;;  %v3525_v52 = vld [vmem:[%s3829_s22 + $0x178] sm:$0xff]  }
  0x55   : > { %v3526_v53 = vld [vmem:[%s3829_s22 + $0x180] sm:$0xff]   ;;  %v3528_v55 = vld [vmem:[%s3829_s22 + $0x188] sm:$0xff]   ;;  %v3530_v57 = vld [vmem:[%s3829_s22 + $0x190] sm:$0xff]  }
  0x56   : > { %3276 = vmatpush3.bf16.msra.mxu0 %v3840_v2  ;;  %3298 = vmatpush3.bf16.msra.mxu1 %v3840_v2  ;;  %v3527_v54 = vld [vmem:[%s3829_s22 + $0x1c0] sm:$0xff]   ;;  %v3529_v56 = vld [vmem:[%s3829_s22 + $0x1c8] sm:$0xff]   ;;  %v3531_v58 = vld [vmem:[%s3829_s22 + $0x1d0] sm:$0xff]  }
  0x57   : > { %3435 = vmatprep.subr.msk.bf16.mxu0 %vm957_vm1, %v3847_v3  ;;  %3436 = vmatprep.subr.msk.bf16.mxu1 %vm957_vm1, %v3847_v3  ;;  %v3532_v59 = vld [vmem:[%s3829_s22 + $0x198] sm:$0xff]   ;;  %v3534_v61 = vld [vmem:[%s3829_s22 + $0x1a0] sm:$0xff]   ;;  %v3536_v63 = vld [vmem:[%s3829_s22 + $0x1a8] sm:$0xff]  }
  0x58   : > { %v3533_v60 = vld [vmem:[%s3829_s22 + $0x1d8] sm:$0xff]   ;;  %v3535_v62 = vld [vmem:[%s3829_s22 + $0x1e0] sm:$0xff]   ;;  %v3537_v0 = vld [vmem:[%s3829_s22 + $0x1e8] sm:$0xff]  }
  0x59   : > { %3240 = vmatmul.mubr.msk.bf16.gmra.mrb[4].mxu0 %vm932_vm0, %v3484_v11  ;;  %3262 = vmatmul.mubr.msk.bf16.gmra.mrb[4].mxu1 %vm932_vm0, %v3485_v12  ;;  %v3541_v4 = vld [vmem:[%s3829_s22 + $0x1f8] sm:$0xff]  }
  0x5a   : > { %3243 = vmatprep.mubr.msk.bf16.mxu0 %vm932_vm0, %v3486_v13  ;;  %3265 = vmatprep.mubr.msk.bf16.mxu1 %vm932_vm0, %v3487_v14  ;;  %v4038_v5 = vld [vmem:[%s4252_s2] ss:$0 sm:$0xff] }
  0x5b   : > { %3278 = vmatpush3.bf16.msra.mxu0 %v3865_v6  ;;  %3300 = vmatpush3.bf16.msra.mxu1 %v3865_v6 }
  0x5c   : > { %3317 = vmatprep.subr.bf16.mxu0 %v3835_v1  ;;  %3339 = vmatprep.subr.bf16.mxu1 %v3835_v1 }
  0x61   : > { %3244 = vmatmul.mubr.msk.bf16.gmra.mrb[8].mxu0 %vm932_vm0, %v3488_v15  ;;  %3266 = vmatmul.mubr.msk.bf16.gmra.mrb[8].mxu1 %vm932_vm0, %v3489_v16 }
  0x62   : > { %3247 = vmatprep.mubr.msk.bf16.mxu0 %vm932_vm0, %v3490_v17  ;;  %3269 = vmatprep.mubr.msk.bf16.mxu1 %vm932_vm0, %v3491_v18 }
  0x69   : > { %3248 = vmatmul.mubr.msk.bf16.gmra.mrb[12].mxu0 %vm932_vm0, %v3492_v19  ;;  %3270 = vmatmul.mubr.msk.bf16.gmra.mrb[12].mxu1 %vm932_vm0, %v3493_v20 }
  0x6a   : > { %3279 = vmatprep.mubr.msk.bf16.mxu0 %vm932_vm0, %v3494_v21  ;;  %3301 = vmatprep.mubr.msk.bf16.mxu1 %vm932_vm0, %v3495_v22 }
  0x71   : > { %3280 = vmatmul.mubr.msk.bf16.vlgmr.msra.gmra.mrb[16].mxu0 %vm932_vm0, %v3496_v23  ;;  %3302 = vmatmul.mubr.msk.bf16.vlgmr.msra.gmra.mrb[16].mxu1 %vm932_vm0, %v3497_v24 }
  0x72   : > { %3318 = vmatpush3.bf16.msra.mxu0 %v3835_v1  ;;  %3340 = vmatpush3.bf16.msra.mxu1 %v3835_v1 }
  0x73   : > { %3283 = vmatprep.mubr.msk.bf16.mxu0 %vm932_vm0, %v3498_v25  ;;  %3305 = vmatprep.mubr.msk.bf16.mxu1 %vm932_vm0, %v3499_v26 }
  0x74   : > { %3319 = vmatprep.subr.bf16.mxu0 %v3840_v2  ;;  %3341 = vmatprep.subr.bf16.mxu1 %v3840_v2 }
  0x76   : > { %3320 = vmatpush3.bf16.msra.mxu0 %v3840_v2  ;;  %3342 = vmatpush3.bf16.msra.mxu1 %v3840_v2 }
  0x77   : > { %3437 = vmatprep.subr.msk.bf16.mxu0 %vm957_vm1, %v3847_v3  ;;  %3438 = vmatprep.subr.msk.bf16.mxu1 %vm957_vm1, %v3847_v3 }
  0x79   : > { %3284 = vmatmul.mubr.msk.bf16.gmra.mrb[20].mxu0 %vm932_vm0, %v3500_v27  ;;  %3306 = vmatmul.mubr.msk.bf16.gmra.mrb[20].mxu1 %vm932_vm0, %v3501_v28 }
  0x7a   : > { %3287 = vmatprep.mubr.msk.bf16.mxu0 %vm932_vm0, %v3502_v29  ;;  %3309 = vmatprep.mubr.msk.bf16.mxu1 %vm932_vm0, %v3503_v30 }
  0x7b   : > { %3322 = vmatpush3.bf16.msra.mxu0 %v3865_v6  ;;  %3344 = vmatpush3.bf16.msra.mxu1 %v3865_v6 }
  0x7c   : > { %3361 = vmatprep.subr.bf16.mxu0 %v3835_v1  ;;  %3383 = vmatprep.subr.bf16.mxu1 %v3835_v1 }
  0x81   : > { %3288 = vmatmul.mubr.msk.bf16.gmra.mrb[24].mxu0 %vm932_vm0, %v3504_v31  ;;  %3310 = vmatmul.mubr.msk.bf16.gmra.mrb[24].mxu1 %vm932_vm0, %v3505_v32 }
  0x82   : > { %3291 = vmatprep.mubr.msk.bf16.mxu0 %vm932_vm0, %v3506_v33  ;;  %3313 = vmatprep.mubr.msk.bf16.mxu1 %vm932_vm0, %v3507_v34 }
  0x89   : > { %3292 = vmatmul.mubr.msk.bf16.gmra.mrb[28].mxu0 %vm932_vm0, %v3508_v35  ;;  %3314 = vmatmul.mubr.msk.bf16.gmra.mrb[28].mxu1 %vm932_vm0, %v3509_v36 }
  0x8a   : > { %3323 = vmatprep.mubr.msk.bf16.mxu0 %vm932_vm0, %v3510_v37  ;;  %3345 = vmatprep.mubr.msk.bf16.mxu1 %vm932_vm0, %v3511_v38 }
  0x91   : > { %3324 = vmatmul.mubr.msk.bf16.vlgmr.msra.gmra.mrb[32].mxu0 %vm932_vm0, %v3512_v39  ;;  %3346 = vmatmul.mubr.msk.bf16.vlgmr.msra.gmra.mrb[32].mxu1 %vm932_vm0, %v3513_v40 }
  0x92   : > { %3362 = vmatpush3.bf16.msra.mxu0 %v3835_v1  ;;  %3384 = vmatpush3.bf16.msra.mxu1 %v3835_v1  ;;  %v3538_v1 = vld [vmem:[%s3829_s22 + $0x1b0] sm:$0xff]  }
  0x93   : > { %3327 = vmatprep.mubr.msk.bf16.mxu0 %vm932_vm0, %v3514_v41  ;;  %3349 = vmatprep.mubr.msk.bf16.mxu1 %vm932_vm0, %v3515_v42 }
  0x94   : > { %3363 = vmatprep.subr.bf16.mxu0 %v3840_v2  ;;  %3385 = vmatprep.subr.bf16.mxu1 %v3840_v2 }
  0x96   : > { %3364 = vmatpush3.bf16.msra.mxu0 %v3840_v2  ;;  %3386 = vmatpush3.bf16.msra.mxu1 %v3840_v2  ;;  %v3539_v2 = vld [vmem:[%s3829_s22 + $0x1f0] sm:$0xff]  }
  0x97   : > { %3439 = vmatprep.subr.msk.bf16.mxu0 %vm957_vm1, %v3847_v3  ;;  %3440 = vmatprep.subr.msk.bf16.mxu1 %vm957_vm1, %v3847_v3  ;;  %v3540_v3 = vld [vmem:[%s3829_s22 + $0x1b8] sm:$0xff]  }
  0x99   : > { %3328 = vmatmul.mubr.msk.bf16.gmra.mrb[36].mxu0 %vm932_vm0, %v3516_v43  ;;  %3350 = vmatmul.mubr.msk.bf16.gmra.mrb[36].mxu1 %vm932_vm0, %v3517_v44 }
  0x9a   : > { %3331 = vmatprep.mubr.msk.bf16.mxu0 %vm932_vm0, %v3518_v45  ;;  %3353 = vmatprep.mubr.msk.bf16.mxu1 %vm932_vm0, %v3519_v46 }
  0x9b   : > { %3366 = vmatpush3.bf16.msra.mxu0 %v3865_v6  ;;  %3388 = vmatpush3.bf16.msra.mxu1 %v3865_v6 }
  0xa1   : > { %3332 = vmatmul.mubr.msk.bf16.gmra.mrb[40].mxu0 %vm932_vm0, %v3520_v47  ;;  %3354 = vmatmul.mubr.msk.bf16.gmra.mrb[40].mxu1 %vm932_vm0, %v3521_v48 }
  0xa2   : > { %3335 = vmatprep.mubr.msk.bf16.mxu0 %vm932_vm0, %v3522_v49  ;;  %3357 = vmatprep.mubr.msk.bf16.mxu1 %vm932_vm0, %v3523_v50 }
  0xa9   : > { %3336 = vmatmul.mubr.msk.bf16.gmra.mrb[44].mxu0 %vm932_vm0, %v3524_v51  ;;  %3358 = vmatmul.mubr.msk.bf16.gmra.mrb[44].mxu1 %vm932_vm0, %v3525_v52 }
  0xaa   : > { %3367 = vmatprep.mubr.msk.bf16.mxu0 %vm932_vm0, %v3526_v53  ;;  %3389 = vmatprep.mubr.msk.bf16.mxu1 %vm932_vm0, %v3527_v54 }
  0xb1   : > { %3368 = vmatmul.mubr.msk.bf16.vlgmr.msra.gmra.mrb[48].mxu0 %vm932_vm0, %v3528_v55  ;;  %3390 = vmatmul.mubr.msk.bf16.vlgmr.msra.gmra.mrb[48].mxu1 %vm932_vm0, %v3529_v56 }
  0xb2   : > { %3371 = vmatprep.mubr.msk.bf16.mxu0 %vm932_vm0, %v3530_v57  ;;  %3393 = vmatprep.mubr.msk.bf16.mxu1 %vm932_vm0, %v3531_v58 }
  0xb9   : > { %3372 = vmatmul.mubr.msk.bf16.gmra.mrb[52].mxu0 %vm932_vm0, %v3532_v59  ;;  %3394 = vmatmul.mubr.msk.bf16.gmra.mrb[52].mxu1 %vm932_vm0, %v3533_v60 }
  0xba   : > { %3375 = vmatprep.mubr.msk.bf16.mxu0 %vm932_vm0, %v3534_v61  ;;  %3397 = vmatprep.mubr.msk.bf16.mxu1 %vm932_vm0, %v3535_v62 }
  0xc1   : > { %3376 = vmatmul.mubr.msk.bf16.gmra.mrb[56].mxu0 %vm932_vm0, %v3536_v63  ;;  %3398 = vmatmul.mubr.msk.bf16.gmra.mrb[56].mxu1 %vm932_vm0, %v3537_v0 }
  0xc2   : > { %3379 = vmatprep.mubr.msk.bf16.mxu0 %vm932_vm0, %v3538_v1  ;;  %3401 = vmatprep.mubr.msk.bf16.mxu1 %vm932_vm0, %v3539_v2 }
  0xc9   : > { %3380 = vmatmul.mubr.msk.bf16.gmra.mrb[60].mxu0 %vm932_vm0, %v3540_v3  ;;  %3402 = vmatmul.mubr.msk.bf16.gmra.mrb[60].mxu1 %vm932_vm0, %v3541_v4 }
 0x124   : > { %v3237_v6 = vpop.f32.mrb[0].mxu0  ;;  %v3259_v7 = vpop.f32.mrb[0].mxu1 }
 0x125   : > { %v995_v8 = vpop.f32.mrb[1].mxu0  ;;  %v1210_v9 = vpop.f32.mrb[1].mxu1  ;;  %v1004_v16 = vadd.f32 %v3237_v6, %v4038_v5  ;;  %v1219_v17 = vadd.f32 %v3259_v7, %v4038_v5 }
 0x126   : > { %v996_v10 = vadd.f32 %v4038_v5, %v995_v8  ;;  %v1211_v11 = vadd.f32 %v4038_v5, %v1210_v9  ;;  %v3238_v12 = vpop.f32.mrb[2].mxu0  ;;  %v3260_v13 = vpop.f32.mrb[2].mxu1 }
 0x127   : > { %v998_v14 = vpop.f32.mrb[3].mxu0  ;;  %v1213_v15 = vpop.f32.mrb[3].mxu1  ;;  %v1007_v20 = vadd.f32 %v3238_v12, %v4038_v5  ;;  %v1222_v21 = vadd.f32 %v3260_v13, %v4038_v5  ;;  %v1060_v26 = vmax.f32 %v1004_v16, 0.0  ;;  %v1275_v27 = vmax.f32 %v1219_v17, 0.0 }
 0x128   : > { %v999_v18 = vadd.f32 %v4038_v5, %v998_v14  ;;  %v1214_v19 = vadd.f32 %v4038_v5, %v1213_v15  ;;  %v1058_v22 = vmax.f32 %v996_v10, 0.0  ;;  %v1273_v23 = vmax.f32 %v1211_v11, 0.0 }
 0x129   : > { %v1061_v32 = vmax.f32 %v1007_v20, 0.0  ;;  %v1276_v33 = vmax.f32 %v1222_v21, 0.0 }
 0x12a   : > { %v1059_v24 = vmax.f32 %v999_v18, 0.0  ;;  %v1274_v25 = vmax.f32 %v1214_v19, 0.0 }
 0x12c   : > { %v1074_v28 = vadd.f32 %v1059_v24, %v1058_v22  ;;  %v1289_v29 = vadd.f32 %v1274_v25, %v1273_v23  ;;  %v3241_v30 = vpop.f32.mrb[4].mxu0  ;;  %v3263_v31 = vpop.f32.mrb[4].mxu1 }
 0x12d   : > { %v1011_v34 = vpop.f32.mrb[5].mxu0  ;;  %v1226_v35 = vpop.f32.mrb[5].mxu1  ;;  %v1020_v48 = vadd.f32 %v3241_v30, %v4038_v5  ;;  %v1235_v49 = vadd.f32 %v3263_v31, %v4038_v5 }
 0x12e   : > { %v1075_v36 = vadd.f32 %v1074_v28, %v1060_v26  ;;  %v1290_v37 = vadd.f32 %v1289_v29, %v1275_v27  ;;  %v1012_v38 = vadd.f32 %v4038_v5, %v1011_v34  ;;  %v1227_v39 = vadd.f32 %v4038_v5, %v1226_v35  ;;  %v3242_v40 = vpop.f32.mrb[6].mxu0  ;;  %v3264_v41 = vpop.f32.mrb[6].mxu1 }
 0x12f   : > { %v1014_v42 = vpop.f32.mrb[7].mxu0  ;;  %v1229_v43 = vpop.f32.mrb[7].mxu1  ;;  %v1023_v54 = vadd.f32 %v3242_v40, %v4038_v5  ;;  %v1238_v55 = vadd.f32 %v3264_v41, %v4038_v5  ;;  %v1064_v60 = vmax.f32 %v1020_v48, 0.0  ;;  %v1279_v61 = vmax.f32 %v1235_v49, 0.0 }
 0x130   : > { %v1062_v44 = vmax.f32 %v1012_v38, 0.0  ;;  %v1076_v45 = vadd.f32 %v1075_v36, %v1061_v32  ;;  %v1277_v46 = vmax.f32 %v1227_v39, 0.0  ;;  %v1291_v47 = vadd.f32 %v1290_v37, %v1276_v33 }
 0x131   : > { %v1015_v50 = vadd.f32 %v4038_v5, %v1014_v42  ;;  %v1230_v51 = vadd.f32 %v4038_v5, %v1229_v43  ;;  %v1065_v7 = vmax.f32 %v1023_v54, 0.0  ;;  %v1280_v8 = vmax.f32 %v1238_v55, 0.0 }
 0x132   : > { %v1077_v52 = vadd.f32 %v1076_v45, %v1062_v44  ;;  %v1292_v53 = vadd.f32 %v1291_v47, %v1277_v46 }
 0x133   : > { %v1063_v56 = vmax.f32 %v1015_v50, 0.0  ;;  %v1278_v57 = vmax.f32 %v1230_v51, 0.0 }
 0x134   : > { %v3245_v58 = vpop.f32.mrb[8].mxu0  ;;  %v3267_v59 = vpop.f32.mrb[8].mxu1 }
 0x135   : > { %v1078_v62 = vadd.f32 %v1077_v52, %v1063_v56  ;;  %v1293_v63 = vadd.f32 %v1292_v53, %v1278_v57  ;;  %v1027_v0 = vpop.f32.mrb[9].mxu0  ;;  %v1242_v1 = vpop.f32.mrb[9].mxu1  ;;  %v1036_v13 = vadd.f32 %v3245_v58, %v4038_v5  ;;  %v1251_v14 = vadd.f32 %v3267_v59, %v4038_v5 }
 0x136   : > { %v1028_v2 = vadd.f32 %v4038_v5, %v1027_v0  ;;  %v1243_v3 = vadd.f32 %v4038_v5, %v1242_v1  ;;  %v3246_v4 = vpop.f32.mrb[10].mxu0  ;;  %v3268_v6 = vpop.f32.mrb[10].mxu1 }
 0x137   : > { %v1079_v9 = vadd.f32 %v1078_v62, %v1064_v60  ;;  %v1294_v10 = vadd.f32 %v1293_v63, %v1279_v61  ;;  %v1030_v11 = vpop.f32.mrb[11].mxu0  ;;  %v1245_v12 = vpop.f32.mrb[11].mxu1  ;;  %v1039_v21 = vadd.f32 %v3246_v4, %v4038_v5  ;;  %v1254_v22 = vadd.f32 %v3268_v6, %v4038_v5 }
 0x138   : > { %v1066_v15 = vmax.f32 %v1028_v2, 0.0  ;;  %v1281_v16 = vmax.f32 %v1243_v3, 0.0  ;;  %v1031_v19 = vadd.f32 %v4038_v5, %v1030_v11  ;;  %v1246_v20 = vadd.f32 %v4038_v5, %v1245_v12 }
 0x139   : > { %v1080_v17 = vadd.f32 %v1079_v9, %v1065_v7  ;;  %v1295_v18 = vadd.f32 %v1294_v10, %v1280_v8  ;;  %v1068_v29 = vmax.f32 %v1036_v13, 0.0  ;;  %v1283_v30 = vmax.f32 %v1251_v14, 0.0 }
 0x13a   : > { %v1067_v25 = vmax.f32 %v1031_v19, 0.0  ;;  %v1282_v26 = vmax.f32 %v1246_v20, 0.0  ;;  %v1069_v39 = vmax.f32 %v1039_v21, 0.0  ;;  %v1284_v40 = vmax.f32 %v1254_v22, 0.0 }
 0x13b   : > { %v1081_v23 = vadd.f32 %v1080_v17, %v1066_v15  ;;  %v1296_v24 = vadd.f32 %v1295_v18, %v1281_v16 }
 0x13c   : > { %v3249_v27 = vpop.f32.mrb[12].mxu0  ;;  %v3271_v28 = vpop.f32.mrb[12].mxu1 }
 0x13d   : > { %v1082_v31 = vadd.f32 %v1081_v23, %v1067_v25  ;;  %v1297_v32 = vadd.f32 %v1296_v24, %v1282_v26  ;;  %v1043_v33 = vpop.f32.mrb[13].mxu0  ;;  %v1258_v34 = vpop.f32.mrb[13].mxu1  ;;  %v1052_v45 = vadd.f32 %v3249_v27, %v4038_v5  ;;  %v1267_v46 = vadd.f32 %v3271_v28, %v4038_v5 }
 0x13e   : > { %v1044_v35 = vadd.f32 %v4038_v5, %v1043_v33  ;;  %v1259_v36 = vadd.f32 %v4038_v5, %v1258_v34  ;;  %v3250_v37 = vpop.f32.mrb[14].mxu0  ;;  %v3272_v38 = vpop.f32.mrb[14].mxu1 }
 0x13f   : > { %v1083_v41 = vadd.f32 %v1082_v31, %v1068_v29  ;;  %v1298_v42 = vadd.f32 %v1297_v32, %v1283_v30  ;;  %v1046_v43 = vpop.f32.mrb[15].mxu0  ;;  %v1261_v44 = vpop.f32.mrb[15].mxu1  ;;  %v1055_v53 = vadd.f32 %v3250_v37, %v4038_v5  ;;  %v1270_v54 = vadd.f32 %v3272_v38, %v4038_v5 }
 0x140   : > { %v1070_v47 = vmax.f32 %v1044_v35, 0.0  ;;  %v1285_v48 = vmax.f32 %v1259_v36, 0.0  ;;  %v1047_v51 = vadd.f32 %v4038_v5, %v1046_v43  ;;  %v1262_v52 = vadd.f32 %v4038_v5, %v1261_v44 }
 0x141   : > { %v1084_v49 = vadd.f32 %v1083_v41, %v1069_v39  ;;  %v1299_v50 = vadd.f32 %v1298_v42, %v1284_v40  ;;  %v1072_v61 = vmax.f32 %v1052_v45, 0.0  ;;  %v1287_v62 = vmax.f32 %v1267_v46, 0.0 }
 0x142   : > { %v1071_v57 = vmax.f32 %v1047_v51, 0.0  ;;  %v1286_v58 = vmax.f32 %v1262_v52, 0.0  ;;  %v1073_v8 = vmax.f32 %v1055_v53, 0.0  ;;  %v1288_v9 = vmax.f32 %v1270_v54, 0.0 }
 0x143   : > { %v1085_v55 = vadd.f32 %v1084_v49, %v1070_v47  ;;  %v1300_v56 = vadd.f32 %v1299_v50, %v1285_v48 }
 0x144   : > { %v3281_v59 = vpop.f32.mrb[16].mxu0  ;;  %v3303_v60 = vpop.f32.mrb[16].mxu1 }
 0x145   : > { %v1086_v63 = vadd.f32 %v1085_v55, %v1071_v57  ;;  %v1301_v0 = vadd.f32 %v1300_v56, %v1286_v58  ;;  %v1425_v1 = vpop.f32.mrb[17].mxu0  ;;  %v1640_v2 = vpop.f32.mrb[17].mxu1  ;;  %v1434_v14 = vadd.f32 %v3281_v59, %v4038_v5  ;;  %v1649_v15 = vadd.f32 %v3303_v60, %v4038_v5 }
 0x146   : > { %v1426_v3 = vadd.f32 %v4038_v5, %v1425_v1  ;;  %v1641_v4 = vadd.f32 %v4038_v5, %v1640_v2  ;;  %v3282_v6 = vpop.f32.mrb[18].mxu0  ;;  %v3304_v7 = vpop.f32.mrb[18].mxu1 }
 0x147   : > { %v1087_v10 = vadd.f32 %v1086_v63, %v1072_v61  ;;  %v1302_v11 = vadd.f32 %v1301_v0, %v1287_v62  ;;  %v1428_v12 = vpop.f32.mrb[19].mxu0  ;;  %v1643_v13 = vpop.f32.mrb[19].mxu1  ;;  %v1437_v22 = vadd.f32 %v3282_v6, %v4038_v5  ;;  %v1652_v23 = vadd.f32 %v3304_v7, %v4038_v5 }
 0x148   : > { %v1429_v18 = vadd.f32 %v4038_v5, %v1428_v12  ;;  %v1644_v19 = vadd.f32 %v4038_v5, %v1643_v13  ;;  %v1488_v20 = vmax.f32 %v1426_v3, 0.0  ;;  %v1703_v21 = vmax.f32 %v1641_v4, 0.0 }
 0x149   : > { %v1088_v16 = vadd.f32 %v1087_v10, %v1073_v8  ;;  %v1303_v17 = vadd.f32 %v1302_v11, %v1288_v9  ;;  %v1490_v28 = vmax.f32 %v1434_v14, 0.0  ;;  %v1705_v29 = vmax.f32 %v1649_v15, 0.0 }
 0x14a   : > { %v1489_v26 = vmax.f32 %v1429_v18, 0.0  ;;  %v1704_v27 = vmax.f32 %v1644_v19, 0.0  ;;  %v1491_v38 = vmax.f32 %v1437_v22, 0.0  ;;  %v1706_v39 = vmax.f32 %v1652_v23, 0.0 }
 0x14b   : > { %v1089_v24 = vrot.slane %v1088_v16, 4  ;;  %v1304_v25 = vrot.slane %v1303_v17, 4 }
 0x14c   : > { %v3285_v30 = vpop.f32.mrb[20].mxu0  ;;  %v3307_v31 = vpop.f32.mrb[20].mxu1  ;;  %v1504_v34 = vadd.f32 %v1489_v26, %v1488_v20  ;;  %v1719_v35 = vadd.f32 %v1704_v27, %v1703_v21 }
 0x14d   : > { %v1090_v32 = vadd.f32 %v1089_v24, %v1088_v16  ;;  %v1305_v33 = vadd.f32 %v1304_v25, %v1303_v17  ;;  %v1441_v36 = vpop.f32.mrb[21].mxu0  ;;  %v1656_v37 = vpop.f32.mrb[21].mxu1  ;;  %v1450_v50 = vadd.f32 %v3285_v30, %v4038_v5  ;;  %v1665_v51 = vadd.f32 %v3307_v31, %v4038_v5 }
 0x14e   : > { %v1442_v40 = vadd.f32 %v4038_v5, %v1441_v36  ;;  %v1657_v41 = vadd.f32 %v4038_v5, %v1656_v37  ;;  %v3286_v42 = vpop.f32.mrb[22].mxu0  ;;  %v3308_v43 = vpop.f32.mrb[22].mxu1  ;;  %v1505_v46 = vadd.f32 %v1504_v34, %v1490_v28  ;;  %v1720_v47 = vadd.f32 %v1719_v35, %v1705_v29 }
 0x14f   : > { %v1091_v44 = vrot.slane %v1090_v32, 2  ;;  %v1306_v45 = vrot.slane %v1305_v33, 2  ;;  %v1444_v48 = vpop.f32.mrb[23].mxu0  ;;  %v1659_v49 = vpop.f32.mrb[23].mxu1  ;;  %v1453_v58 = vadd.f32 %v3286_v42, %v4038_v5  ;;  %v1668_v59 = vadd.f32 %v3308_v43, %v4038_v5 }
 0x150   : > { %v1492_v52 = vmax.f32 %v1442_v40, 0.0  ;;  %v1707_v53 = vmax.f32 %v1657_v41, 0.0  ;;  %v1506_v56 = vadd.f32 %v1505_v46, %v1491_v38  ;;  %v1721_v57 = vadd.f32 %v1720_v47, %v1706_v39 }
 0x151   : > { %v1092_v54 = vadd.f32 %v1091_v44, %v1090_v32  ;;  %v1307_v55 = vadd.f32 %v1306_v45, %v1305_v33  ;;  %v1445_v60 = vadd.f32 %v4038_v5, %v1444_v48  ;;  %v1660_v61 = vadd.f32 %v4038_v5, %v1659_v49 }
 0x152   : > { %v1507_v0 = vadd.f32 %v1506_v56, %v1492_v52  ;;  %v1722_v1 = vadd.f32 %v1721_v57, %v1707_v53  ;;  %v1494_v9 = vmax.f32 %v1450_v50, 0.0  ;;  %v1709_v10 = vmax.f32 %v1665_v51, 0.0 }
 0x153   : > { %v1093_v62 = vrot.slane %v1092_v54, 1  ;;  %v1308_v63 = vrot.slane %v1307_v55, 1  ;;  %v1493_v2 = vmax.f32 %v1445_v60, 0.0  ;;  %v1708_v3 = vmax.f32 %v1660_v61, 0.0 }
 0x154   : > { %v3289_v4 = vpop.f32.mrb[24].mxu0  ;;  %v3311_v6 = vpop.f32.mrb[24].mxu1  ;;  %v1495_v20 = vmax.f32 %v1453_v58, 0.0  ;;  %v1710_v21 = vmax.f32 %v1668_v59, 0.0 }
 0x155   : > { %v1094_v7 = vadd.f32 %v1093_v62, %v1092_v54  ;;  %v1309_v8 = vadd.f32 %v1308_v63, %v1307_v55  ;;  %v1457_v11 = vpop.f32.mrb[25].mxu0  ;;  %v1672_v12 = vpop.f32.mrb[25].mxu1  ;;  %v1508_v13 = vadd.f32 %v1507_v0, %v1493_v2  ;;  %v1723_v14 = vadd.f32 %v1722_v1, %v1708_v3 }
 0x156   : > { %v1458_v15 = vadd.f32 %v4038_v5, %v1457_v11  ;;  %v1673_v16 = vadd.f32 %v4038_v5, %v1672_v12  ;;  %v3290_v17 = vpop.f32.mrb[26].mxu0  ;;  %v3312_v18 = vpop.f32.mrb[26].mxu1  ;;  %v1466_v28 = vadd.f32 %v3289_v4, %v4038_v5  ;;  %v1681_v29 = vadd.f32 %v3311_v6, %v4038_v5 }
 0x157   : > { %v4091_v19 = vsel %vm2601_vm2, %v1094_v7, %v1309_v8  ;;  %v1460_v22 = vpop.f32.mrb[27].mxu0  ;;  %v1675_v23 = vpop.f32.mrb[27].mxu1  ;;  %v1509_v24 = vadd.f32 %v1508_v13, %v1494_v9  ;;  %v1724_v25 = vadd.f32 %v1723_v14, %v1709_v10  ;;  %v1469_v34 = vadd.f32 %v3290_v17, %v4038_v5 }
 0x158   : > { %v1496_v26 = vmax.f32 %v1458_v15, 0.0  ;;  %v1711_v27 = vmax.f32 %v1673_v16, 0.0  ;;  %v1461_v30 = vadd.f32 %v4038_v5, %v1460_v22  ;;  %v1676_v31 = vadd.f32 %v4038_v5, %v1675_v23 }
 0x159   : > { %v1510_v32 = vadd.f32 %v1509_v24, %v1495_v20  ;;  %v1725_v33 = vadd.f32 %v1724_v25, %v1710_v21  ;;  %v1684_v35 = vadd.f32 %v3312_v18, %v4038_v5  ;;  %v1498_v42 = vmax.f32 %v1466_v28, 0.0 }
 0x15a   : > { %v1497_v36 = vmax.f32 %v1461_v30, 0.0  ;;  %v1712_v37 = vmax.f32 %v1676_v31, 0.0  ;;  %v1713_v43 = vmax.f32 %v1681_v29, 0.0  ;;  %v1499_v52 = vmax.f32 %v1469_v34, 0.0 }
 0x15b   : > { %v1511_v38 = vadd.f32 %v1510_v32, %v1496_v26  ;;  %v1726_v39 = vadd.f32 %v1725_v33, %v1711_v27  ;;  %v1714_v53 = vmax.f32 %v1684_v35, 0.0 }
 0x15c   : > { %v3293_v40 = vpop.f32.mrb[28].mxu0  ;;  %v3315_v41 = vpop.f32.mrb[28].mxu1 }
 0x15d   : > { %v1473_v44 = vpop.f32.mrb[29].mxu0  ;;  %v1688_v45 = vpop.f32.mrb[29].mxu1  ;;  %v1512_v46 = vadd.f32 %v1511_v38, %v1497_v36  ;;  %v1727_v47 = vadd.f32 %v1726_v39, %v1712_v37  ;;  %v1482_v62 = vadd.f32 %v3293_v40, %v4038_v5  ;;  %v1697_v63 = vadd.f32 %v3315_v41, %v4038_v5 }
 0x15e   : > { %v1474_v48 = vadd.f32 %v4038_v5, %v1473_v44  ;;  %v1689_v49 = vadd.f32 %v4038_v5, %v1688_v45  ;;  %v3294_v50 = vpop.f32.mrb[30].mxu0  ;;  %v3316_v51 = vpop.f32.mrb[30].mxu1 }
 0x15f   : > { %v1476_v54 = vpop.f32.mrb[31].mxu0  ;;  %v1691_v55 = vpop.f32.mrb[31].mxu1  ;;  %v1513_v56 = vadd.f32 %v1512_v46, %v1498_v42  ;;  %v1728_v57 = vadd.f32 %v1727_v47, %v1713_v43  ;;  %v1485_v7 = vadd.f32 %v3294_v50, %v4038_v5  ;;  %v1700_v8 = vadd.f32 %v3316_v51, %v4038_v5 }
 0x160   : > { %v1500_v58 = vmax.f32 %v1474_v48, 0.0  ;;  %v1715_v59 = vmax.f32 %v1689_v49, 0.0  ;;  %v1477_v60 = vadd.f32 %v4038_v5, %v1476_v54  ;;  %v1692_v61 = vadd.f32 %v4038_v5, %v1691_v55 }
 0x161   : > { %v1514_v0 = vadd.f32 %v1513_v56, %v1499_v52  ;;  %v1729_v1 = vadd.f32 %v1728_v57, %v1714_v53  ;;  %v1502_v13 = vmax.f32 %v1482_v62, 0.0  ;;  %v1717_v14 = vmax.f32 %v1697_v63, 0.0 }
 0x162   : > { %v1501_v2 = vmax.f32 %v1477_v60, 0.0  ;;  %v1716_v3 = vmax.f32 %v1692_v61, 0.0  ;;  %v1503_v24 = vmax.f32 %v1485_v7, 0.0  ;;  %v1718_v25 = vmax.f32 %v1700_v8, 0.0 }
 0x163   : > { %v1515_v4 = vadd.f32 %v1514_v0, %v1500_v58  ;;  %v1730_v6 = vadd.f32 %v1729_v1, %v1715_v59 }
 0x164   : > { %v3325_v9 = vpop.f32.mrb[32].mxu0  ;;  %v3347_v10 = vpop.f32.mrb[32].mxu1 }
 0x165   : > { %v1855_v11 = vpop.f32.mrb[33].mxu0  ;;  %v2070_v12 = vpop.f32.mrb[33].mxu1  ;;  %v1516_v15 = vadd.f32 %v1515_v4, %v1501_v2  ;;  %v1731_v16 = vadd.f32 %v1730_v6, %v1716_v3  ;;  %v1864_v28 = vadd.f32 %v3325_v9, %v4038_v5  ;;  %v2079_v29 = vadd.f32 %v3347_v10, %v4038_v5 }
 0x166   : > { %v3326_v17 = vpop.f32.mrb[34].mxu0  ;;  %v3348_v18 = vpop.f32.mrb[34].mxu1  ;;  %v1856_v20 = vadd.f32 %v4038_v5, %v1855_v11  ;;  %v2071_v21 = vadd.f32 %v4038_v5, %v2070_v12 }
 0x167   : > { %v1858_v22 = vpop.f32.mrb[35].mxu0  ;;  %v2073_v23 = vpop.f32.mrb[35].mxu1  ;;  %v1517_v26 = vadd.f32 %v1516_v15, %v1502_v13  ;;  %v1732_v27 = vadd.f32 %v1731_v16, %v1717_v14  ;;  %v1867_v34 = vadd.f32 %v3326_v17, %v4038_v5  ;;  %v2082_v35 = vadd.f32 %v3348_v18, %v4038_v5 }
 0x168   : > { %v1859_v30 = vadd.f32 %v4038_v5, %v1858_v22  ;;  %v2074_v31 = vadd.f32 %v4038_v5, %v2073_v23  ;;  %v1918_v36 = vmax.f32 %v1856_v20, 0.0  ;;  %v2133_v37 = vmax.f32 %v2071_v21, 0.0 }
 0x169   : > { %v1518_v32 = vadd.f32 %v1517_v26, %v1503_v24  ;;  %v1733_v33 = vadd.f32 %v1732_v27, %v1718_v25  ;;  %v1920_v44 = vmax.f32 %v1864_v28, 0.0  ;;  %v2135_v45 = vmax.f32 %v2079_v29, 0.0 }
 0x16a   : > { %v1919_v38 = vmax.f32 %v1859_v30, 0.0  ;;  %v2134_v39 = vmax.f32 %v2074_v31, 0.0  ;;  %v1921_v56 = vmax.f32 %v1867_v34, 0.0  ;;  %v2136_v57 = vmax.f32 %v2082_v35, 0.0 }
 0x16b   : > { %v1519_v40 = vrot.slane %v1518_v32, 4  ;;  %v1734_v41 = vrot.slane %v1733_v33, 4 }
 0x16c   : > { %v3329_v42 = vpop.f32.mrb[36].mxu0  ;;  %v3351_v43 = vpop.f32.mrb[36].mxu1  ;;  %v1934_v46 = vadd.f32 %v1919_v38, %v1918_v36  ;;  %v2149_v47 = vadd.f32 %v2134_v39, %v2133_v37 }
 0x16d   : > { %v1871_v48 = vpop.f32.mrb[37].mxu0  ;;  %v2086_v49 = vpop.f32.mrb[37].mxu1  ;;  %v1520_v50 = vadd.f32 %v1519_v40, %v1518_v32  ;;  %v1735_v51 = vadd.f32 %v1734_v41, %v1733_v33  ;;  %v1880_v2 = vadd.f32 %v3329_v42, %v4038_v5  ;;  %v2095_v3 = vadd.f32 %v3351_v43, %v4038_v5 }
 0x16e   : > { %v1872_v52 = vadd.f32 %v4038_v5, %v1871_v48  ;;  %v2087_v53 = vadd.f32 %v4038_v5, %v2086_v49  ;;  %v3330_v54 = vpop.f32.mrb[38].mxu0  ;;  %v3352_v55 = vpop.f32.mrb[38].mxu1  ;;  %v1935_v58 = vadd.f32 %v1934_v46, %v1920_v44  ;;  %v2150_v59 = vadd.f32 %v2149_v47, %v2135_v45 }
 0x16f   : > { %v1874_v60 = vpop.f32.mrb[39].mxu0  ;;  %v2089_v61 = vpop.f32.mrb[39].mxu1  ;;  %v1521_v62 = vrot.slane %v1520_v50, 2  ;;  %v1736_v63 = vrot.slane %v1735_v51, 2  ;;  %v1883_v13 = vadd.f32 %v3330_v54, %v4038_v5  ;;  %v2098_v14 = vadd.f32 %v3352_v55, %v4038_v5 }
 0x170   : > { %v1922_v0 = vmax.f32 %v1872_v52, 0.0  ;;  %v2137_v1 = vmax.f32 %v2087_v53, 0.0  ;;  %v1936_v4 = vadd.f32 %v1935_v58, %v1921_v56  ;;  %v2151_v6 = vadd.f32 %v2150_v59, %v2136_v57 }
 0x171   : > { %v1522_v7 = vadd.f32 %v1521_v62, %v1520_v50  ;;  %v1737_v8 = vadd.f32 %v1736_v63, %v1735_v51  ;;  %v1875_v9 = vadd.f32 %v4038_v5, %v1874_v60  ;;  %v2090_v10 = vadd.f32 %v4038_v5, %v2089_v61 }
 0x172   : > { %v1937_v11 = vadd.f32 %v1936_v4, %v1922_v0  ;;  %v2152_v12 = vadd.f32 %v2151_v6, %v2137_v1  ;;  %v1924_v22 = vmax.f32 %v1880_v2, 0.0  ;;  %v2139_v23 = vmax.f32 %v2095_v3, 0.0 }
 0x173   : > { %v1523_v15 = vrot.slane %v1522_v7, 1  ;;  %v1738_v16 = vrot.slane %v1737_v8, 1  ;;  %v1923_v17 = vmax.f32 %v1875_v9, 0.0  ;;  %v2138_v18 = vmax.f32 %v2090_v10, 0.0 }
 0x174   : > { %v3333_v20 = vpop.f32.mrb[40].mxu0  ;;  %v3355_v21 = vpop.f32.mrb[40].mxu1  ;;  %v1925_v32 = vmax.f32 %v1883_v13, 0.0  ;;  %v2140_v38 = vmax.f32 %v2098_v14, 0.0 }
 0x175   : > { %v1887_v24 = vpop.f32.mrb[41].mxu0  ;;  %v2102_v25 = vpop.f32.mrb[41].mxu1  ;;  %v1524_v26 = vadd.f32 %v1523_v15, %v1522_v7  ;;  %v1739_v27 = vadd.f32 %v1738_v16, %v1737_v8  ;;  %v1938_v28 = vadd.f32 %v1937_v11, %v1923_v17  ;;  %v2153_v29 = vadd.f32 %v2152_v12, %v2138_v18 }
 0x176   : > { %v3334_v30 = vpop.f32.mrb[42].mxu0  ;;  %v3356_v31 = vpop.f32.mrb[42].mxu1  ;;  %v1888_v33 = vadd.f32 %v4038_v5, %v1887_v24  ;;  %v2103_v34 = vadd.f32 %v4038_v5, %v2102_v25  ;;  %v1896_v44 = vadd.f32 %v3333_v20, %v4038_v5  ;;  %v2111_v48 = vadd.f32 %v3355_v21, %v4038_v5 }
 0x177   : > { %v1890_v35 = vpop.f32.mrb[43].mxu0  ;;  %v2105_v36 = vpop.f32.mrb[43].mxu1  ;;  %v2603_v37 = vsel %vm957_vm1, %v4091_v19, %v1524_v26  ;;  %v1939_v39 = vadd.f32 %v1938_v28, %v1924_v22  ;;  %v2154_v40 = vadd.f32 %v2153_v29, %v2139_v23  ;;  %v1899_v49 = vadd.f32 %v3334_v30, %v4038_v5 }
 0x178   : > { %v4128_v41 = vsel %vm2604_vm3, %v2603_v37, %v1739_v27  ;;  %v1926_v42 = vmax.f32 %v1888_v33, 0.0  ;;  %v2141_v43 = vmax.f32 %v2103_v34, 0.0  ;;  %v1891_v47 = vadd.f32 %v4038_v5, %v1890_v35 }
 0x179   : > { %v1940_v45 = vadd.f32 %v1939_v39, %v1925_v32  ;;  %v2155_v46 = vadd.f32 %v2154_v40, %v2140_v38  ;;  %v2106_v19 = vadd.f32 %v4038_v5, %v2105_v36  ;;  %v2114_v52 = vadd.f32 %v3356_v31, %v4038_v5 }
 0x17a   : > { %v1927_v53 = vmax.f32 %v1891_v47, 0.0  ;;  %v1928_v59 = vmax.f32 %v1896_v44, 0.0  ;;  %v2143_v1 = vmax.f32 %v2111_v48, 0.0  ;;  %v1929_v6 = vmax.f32 %v1899_v49, 0.0 }
 0x17b   : > { %v1941_v50 = vadd.f32 %v1940_v45, %v1926_v42  ;;  %v2156_v51 = vadd.f32 %v2155_v46, %v2141_v43  ;;  %v2142_v56 = vmax.f32 %v2106_v19, 0.0  ;;  %v2144_v7 = vmax.f32 %v2114_v52, 0.0 }
 0x17c   : > { %v3337_v54 = vpop.f32.mrb[44].mxu0  ;;  %v3359_v55 = vpop.f32.mrb[44].mxu1 }
 0x17d   : > { %v1903_v57 = vpop.f32.mrb[45].mxu0  ;;  %v2118_v58 = vpop.f32.mrb[45].mxu1  ;;  %v1942_v60 = vadd.f32 %v1941_v50, %v1927_v53  ;;  %v2157_v2 = vadd.f32 %v2156_v51, %v2142_v56  ;;  %v1912_v14 = vadd.f32 %v3337_v54, %v4038_v5  ;;  %v2127_v16 = vadd.f32 %v3359_v55, %v4038_v5 }
 0x17e   : > { %v1904_v61 = vadd.f32 %v4038_v5, %v1903_v57  ;;  %v2119_v62 = vadd.f32 %v4038_v5, %v2118_v58  ;;  %v3338_v63 = vpop.f32.mrb[46].mxu0  ;;  %v3360_v0 = vpop.f32.mrb[46].mxu1 }
 0x17f   : > { %v1906_v3 = vpop.f32.mrb[47].mxu0  ;;  %v2121_v4 = vpop.f32.mrb[47].mxu1  ;;  %v1943_v8 = vadd.f32 %v1942_v60, %v1928_v59  ;;  %v2158_v10 = vadd.f32 %v2157_v2, %v2143_v1  ;;  %v1915_v22 = vadd.f32 %v3338_v63, %v4038_v5  ;;  %v2130_v23 = vadd.f32 %v3360_v0, %v4038_v5 }
 0x180   : > { %v1930_v9 = vmax.f32 %v1904_v61, 0.0  ;;  %v2145_v11 = vmax.f32 %v2119_v62, 0.0  ;;  %v1907_v12 = vadd.f32 %v4038_v5, %v1906_v3  ;;  %v2122_v13 = vadd.f32 %v4038_v5, %v2121_v4 }
 0x181   : > { %v1944_v15 = vadd.f32 %v1943_v8, %v1929_v6  ;;  %v2159_v17 = vadd.f32 %v2158_v10, %v2144_v7  ;;  %v1932_v29 = vmax.f32 %v1912_v14, 0.0  ;;  %v2147_v35 = vmax.f32 %v2127_v16, 0.0 }
 0x182   : > { %v1931_v18 = vmax.f32 %v1907_v12, 0.0  ;;  %v2146_v20 = vmax.f32 %v2122_v13, 0.0  ;;  %v1933_v39 = vmax.f32 %v1915_v22, 0.0  ;;  %v2148_v40 = vmax.f32 %v2130_v23, 0.0 }
 0x183   : > { %v1945_v21 = vadd.f32 %v1944_v15, %v1930_v9  ;;  %v2160_v26 = vadd.f32 %v2159_v17, %v2145_v11 }
 0x184   : > { %v3369_v24 = vpop.f32.mrb[48].mxu0  ;;  %v3391_v25 = vpop.f32.mrb[48].mxu1 }
 0x185   : > { %v2285_v27 = vpop.f32.mrb[49].mxu0  ;;  %v2500_v28 = vpop.f32.mrb[49].mxu1  ;;  %v1946_v30 = vadd.f32 %v1945_v21, %v1931_v18  ;;  %v2161_v36 = vadd.f32 %v2160_v26, %v2146_v20  ;;  %v2294_v43 = vadd.f32 %v3369_v24, %v4038_v5  ;;  %v2509_v45 = vadd.f32 %v3391_v25, %v4038_v5 }
 0x186   : > { %v2286_v31 = vadd.f32 %v4038_v5, %v2285_v27  ;;  %v2501_v32 = vadd.f32 %v4038_v5, %v2500_v28  ;;  %v3370_v33 = vpop.f32.mrb[50].mxu0  ;;  %v3392_v34 = vpop.f32.mrb[50].mxu1 }
 0x187   : > { %v2288_v37 = vpop.f32.mrb[51].mxu0  ;;  %v2503_v38 = vpop.f32.mrb[51].mxu1  ;;  %v1947_v42 = vadd.f32 %v1946_v30, %v1932_v29  ;;  %v2162_v44 = vadd.f32 %v2161_v36, %v2147_v35  ;;  %v2297_v50 = vadd.f32 %v3370_v33, %v4038_v5  ;;  %v2512_v52 = vadd.f32 %v3392_v34, %v4038_v5 }
 0x188   : > { %v2289_v46 = vadd.f32 %v4038_v5, %v2288_v37  ;;  %v2504_v47 = vadd.f32 %v4038_v5, %v2503_v38  ;;  %v2348_v49 = vmax.f32 %v2286_v31, 0.0  ;;  %v2563_v19 = vmax.f32 %v2501_v32, 0.0 }
 0x189   : > { %v1948_v48 = vadd.f32 %v1947_v42, %v1933_v39  ;;  %v2163_v51 = vadd.f32 %v2162_v44, %v2148_v40  ;;  %v2350_v56 = vmax.f32 %v2294_v43, 0.0  ;;  %v2565_v60 = vmax.f32 %v2509_v45, 0.0 }
 0x18a   : > { %v2349_v53 = vmax.f32 %v2289_v46, 0.0  ;;  %v2564_v54 = vmax.f32 %v2504_v47, 0.0  ;;  %v2351_v2 = vmax.f32 %v2297_v50, 0.0  ;;  %v2566_v9 = vmax.f32 %v2512_v52, 0.0 }
 0x18b   : > { %v1949_v55 = vrot.slane %v1948_v48, 4  ;;  %v2164_v59 = vrot.slane %v2163_v51, 4 }
 0x18c   : > { %v3373_v57 = vpop.f32.mrb[52].mxu0  ;;  %v3395_v58 = vpop.f32.mrb[52].mxu1  ;;  %v2364_v61 = vadd.f32 %v2349_v53, %v2348_v49  ;;  %v2579_v62 = vadd.f32 %v2564_v54, %v2563_v19 }
 0x18d   : > { %v2301_v63 = vpop.f32.mrb[53].mxu0  ;;  %v2516_v0 = vpop.f32.mrb[53].mxu1  ;;  %v1950_v1 = vadd.f32 %v1949_v55, %v1948_v48  ;;  %v2165_v8 = vadd.f32 %v2164_v59, %v2163_v51  ;;  %v2310_v15 = vadd.f32 %v3373_v57, %v4038_v5  ;;  %v2525_v20 = vadd.f32 %v3395_v58, %v4038_v5 }
 0x18e   : > { %v2302_v3 = vadd.f32 %v4038_v5, %v2301_v63  ;;  %v2517_v4 = vadd.f32 %v4038_v5, %v2516_v0  ;;  %v3374_v6 = vpop.f32.mrb[54].mxu0  ;;  %v3396_v7 = vpop.f32.mrb[54].mxu1  ;;  %v2365_v10 = vadd.f32 %v2364_v61, %v2350_v56  ;;  %v2580_v11 = vadd.f32 %v2579_v62, %v2565_v60 }
 0x18f   : > { %v2304_v12 = vpop.f32.mrb[55].mxu0  ;;  %v2519_v13 = vpop.f32.mrb[55].mxu1  ;;  %v1951_v14 = vrot.slane %v1950_v1, 2  ;;  %v2166_v18 = vrot.slane %v2165_v8, 2  ;;  %v2313_v24 = vadd.f32 %v3374_v6, %v4038_v5  ;;  %v2528_v30 = vadd.f32 %v3396_v7, %v4038_v5 }
 0x190   : > { %v2352_v16 = vmax.f32 %v2302_v3, 0.0  ;;  %v2567_v17 = vmax.f32 %v2517_v4, 0.0  ;;  %v2366_v21 = vadd.f32 %v2365_v10, %v2351_v2  ;;  %v2581_v22 = vadd.f32 %v2580_v11, %v2566_v9 }
 0x191   : > { %v1952_v23 = vadd.f32 %v1951_v14, %v1950_v1  ;;  %v2305_v25 = vadd.f32 %v4038_v5, %v2304_v12  ;;  %v2520_v26 = vadd.f32 %v4038_v5, %v2519_v13  ;;  %v2167_v27 = vadd.f32 %v2166_v18, %v2165_v8 }
 0x192   : > { %v2367_v28 = vadd.f32 %v2366_v21, %v2352_v16  ;;  %v2582_v29 = vadd.f32 %v2581_v22, %v2567_v17  ;;  %v2354_v37 = vmax.f32 %v2310_v15, 0.0  ;;  %v2569_v38 = vmax.f32 %v2525_v20, 0.0  ;;  %v3542_v15 = vld [vmem:[%s4252_s2] ss:$0 sm:$0xff] }
 0x193   : > { %v1953_v31 = vrot.slane %v1952_v23, 1  ;;  %v2353_v32 = vmax.f32 %v2305_v25, 0.0  ;;  %v2568_v33 = vmax.f32 %v2520_v26, 0.0  ;;  %v2168_v36 = vrot.slane %v2167_v27, 1 }
 0x194   : > { %v3377_v34 = vpop.f32.mrb[56].mxu0  ;;  %v3399_v35 = vpop.f32.mrb[56].mxu1  ;;  %v2355_v49 = vmax.f32 %v2313_v24, 0.0  ;;  %v2570_v19 = vmax.f32 %v2528_v30, 0.0 }
 0x195   : > { %v2317_v39 = vpop.f32.mrb[57].mxu0  ;;  %v2532_v40 = vpop.f32.mrb[57].mxu1  ;;  %v1954_v42 = vadd.f32 %v1953_v31, %v1952_v23  ;;  %v2368_v43 = vadd.f32 %v2367_v28, %v2353_v32  ;;  %v2583_v44 = vadd.f32 %v2582_v29, %v2568_v33  ;;  %v2169_v48 = vadd.f32 %v2168_v36, %v2167_v27 }
 0x196   : > { %v2318_v45 = vadd.f32 %v4038_v5, %v2317_v39  ;;  %v3378_v46 = vpop.f32.mrb[58].mxu0  ;;  %v3400_v47 = vpop.f32.mrb[58].mxu1  ;;  %v2533_v50 = vadd.f32 %v4038_v5, %v2532_v40  ;;  %v2326_v58 = vadd.f32 %v3377_v34, %v4038_v5  ;;  %v2541_v59 = vadd.f32 %v3399_v35, %v4038_v5 }
 0x197   : > { %v2320_v51 = vpop.f32.mrb[59].mxu0  ;;  %v2535_v52 = vpop.f32.mrb[59].mxu1  ;;  %v2607_v53 = vsel %vm2606_vm4, %v4128_v41, %v1954_v42  ;;  %v2369_v54 = vadd.f32 %v2368_v43, %v2354_v37  ;;  %v2584_v55 = vadd.f32 %v2583_v44, %v2569_v38  ;;  %v2329_v1 = vadd.f32 %v3378_v46, %v4038_v5 }
 0x198   : > { %v2356_v56 = vmax.f32 %v2318_v45, 0.0  ;;  %v4165_v57 = vsel %vm2608_vm5, %v2607_v53, %v2169_v48  ;;  %v2571_v60 = vmax.f32 %v2533_v50, 0.0  ;;  %v2321_v63 = vadd.f32 %v4038_v5, %v2320_v51 }
 0x199   : > { %v2370_v61 = vadd.f32 %v2369_v54, %v2355_v49  ;;  %v2585_v62 = vadd.f32 %v2584_v55, %v2570_v19  ;;  %v2536_v0 = vadd.f32 %v4038_v5, %v2535_v52  ;;  %v2544_v41 = vadd.f32 %v3400_v47, %v4038_v5 }
 0x19a   : > { %v2357_v4 = vmax.f32 %v2321_v63, 0.0  ;;  %v2358_v9 = vmax.f32 %v2326_v58, 0.0  ;;  %v2573_v10 = vmax.f32 %v2541_v59, 0.0  ;;  %v2359_v20 = vmax.f32 %v2329_v1, 0.0  ;;  %v2600_v63 = vld [vmem:[#allocation2] sm:$0xff] }
 0x19b   : > { %v2371_v2 = vadd.f32 %v2370_v61, %v2356_v56  ;;  %v2586_v3 = vadd.f32 %v2585_v62, %v2571_v60  ;;  %v2572_v6 = vmax.f32 %v2536_v0, 0.0  ;;  %v2574_v21 = vmax.f32 %v2544_v41, 0.0 }
 0x19c   : > { %v3381_v7 = vpop.f32.mrb[60].mxu0  ;;  %v3403_v8 = vpop.f32.mrb[60].mxu1 }
 0x19d   : > { %v2333_v11 = vpop.f32.mrb[61].mxu0  ;;  %v2548_v12 = vpop.f32.mrb[61].mxu1  ;;  %v2372_v13 = vadd.f32 %v2371_v2, %v2357_v4  ;;  %v2587_v14 = vadd.f32 %v2586_v3, %v2572_v6  ;;  %v2342_v30 = vadd.f32 %v3542_v15, %v3381_v7  ;;  %v2557_v31 = vadd.f32 %v3542_v15, %v3403_v8  ;;  %v3543_v2 = vld [vmem:[%s4254_s4] sm:$0xff] (!%p3110_p9)   ;;  %v3544_v4 = vld [vmem:[%s4254_s4 + $0x8] sm:$0xff] (!%p3110_p9)   ;;  %v3547_v8 = vld [vmem:[%s4256_s6 + $0x10] sm:$0xff] (!%p3110_p9)  }
 0x19e   : > { %v2334_v16 = vadd.f32 %v3542_v15, %v2333_v11  ;;  %v2549_v17 = vadd.f32 %v3542_v15, %v2548_v12  ;;  %v3382_v18 = vpop.f32.mrb[62].mxu0  ;;  %v3404_v5 = vpop.f32.mrb[62].mxu1  ;;  %v3610_v3 = vmov (!%p3110_p9), 0.0   ;;  %v3546_v6 = vld [vmem:[%s4256_s6 + $0x8] sm:$0xff] (!%p3110_p9)   ;;  %v2622_v7 = vld [vmem:[%s4253_s3] sm:$0xf] (!%p3110_p9) }
 0x19f   : > { %v2336_v22 = vpop.f32.mrb[63].mxu0  ;;  %v2551_v23 = vpop.f32.mrb[63].mxu1  ;;  %v2373_v24 = vadd.f32 %v2372_v13, %v2358_v9  ;;  %v2588_v25 = vadd.f32 %v2587_v14, %v2573_v10  ;;  %v2345_v38 = vadd.f32 %v3542_v15, %v3382_v18  ;;  %v2560_v39 = vadd.f32 %v3542_v15, %v3404_v5  ;;  %3405 = vmatprep.subr.bf16.mxu0 (!%p3110_p9), %v3610_v3  ;;  %v3548_v9 = vld [vmem:[%s4256_s6 + $0x18] sm:$0xff] (!%p3110_p9)   ;;  %v3549_v10 = vld [vmem:[%s4256_s6 + $0x20] sm:$0xff] (!%p3110_p9)   ;;  %v3550_v11 = vld [vmem:[%s4256_s6 + $0x28] sm:$0xff] (!%p3110_p9)  }
 0x1a0   : > { %v2360_v26 = vmax.f32 %v2334_v16, 0.0  ;;  %v2575_v27 = vmax.f32 %v2549_v17, 0.0  ;;  %v2337_v28 = vadd.f32 %v3542_v15, %v2336_v22  ;;  %v2552_v29 = vadd.f32 %v3542_v15, %v2551_v23  ;;  %3413 = vmatprep.subr.bf16.mxu1 (!%p3110_p9), %v3610_v3  ;;  %3406 = vmatpush3.bf16.msra.mxu0 (!%p3110_p9), %v3543_v2  ;;  %v3551_v12 = vld [vmem:[%s4256_s6 + $0x30] sm:$0xff] (!%p3110_p9)   ;;  %v3552_v13 = vld [vmem:[%s4256_s6 + $0x38] sm:$0xff] (!%p3110_p9)   ;;  %v3111_v14 = vld [vmem:[%s4255_s5] ss:$0 sm:$0xff] (!%p3110_p9) }
 0x1a1   : > { %v2374_v32 = vadd.f32 %v2373_v24, %v2359_v20  ;;  %v2589_v33 = vadd.f32 %v2588_v25, %v2574_v21  ;;  %v2362_v40 = vmax.f32 %v2342_v30, 0.0  ;;  %v2577_v42 = vmax.f32 %v2557_v31, 0.0  ;;  %3409 = vmatprep.mubr.msk.bf16.mxu0 (!%p3110_p9), %vm3611_vm8, %v3610_v3  ;;  %3407 = vmatprep.subr.bf16.mxu0 (!%p3110_p9), %v3610_v3  ;;  %v3115_v25 = vld [vmem:[%s4257_s7] ss:$0 sm:$0xff] (!%p3110_p9) }
 0x1a2   : > { %v2361_v34 = vmax.f32 %v2337_v28, 0.0  ;;  %v2576_v35 = vmax.f32 %v2552_v29, 0.0  ;;  %v2363_v45 = vmax.f32 %v2345_v38, 0.0  ;;  %v2578_v46 = vmax.f32 %v2560_v39, 0.0  ;;  %3429 = vmatprep.mubr.msk.bf16.mxu1 (!%p3110_p9), %vm3611_vm8, %v3610_v3 }
 0x1a3   : > { %v2375_v36 = vadd.f32 %v2374_v32, %v2360_v26  ;;  %v2590_v37 = vadd.f32 %v2589_v33, %v2575_v27 }
 0x1a4   : > { %3408 = vmatpush3.bf16.msra.mxu0 (!%p3110_p9), %v3544_v4 }
 0x1a5   : > { %v2376_v43 = vadd.f32 %v2375_v36, %v2361_v34  ;;  %v2591_v44 = vadd.f32 %v2590_v37, %v2576_v35 }
 0x1a7   : > { %v2377_v47 = vadd.f32 %v2376_v43, %v2362_v40  ;;  %v2592_v48 = vadd.f32 %v2591_v44, %v2577_v42  ;;  %3410 = vmatmul.mubr.msk.bf16.vlgmr.msra.gmra.mrb[0].mxu0 (!%p3110_p9), %vm2646_vm9, %v2622_v7 }
 0x1a9   : > { %v2378_v49 = vadd.f32 %v2377_v47, %v2363_v45  ;;  %v2593_v19 = vadd.f32 %v2592_v48, %v2578_v46 }
 0x1ab   : > { %v2379_v50 = vrot.slane %v2378_v49, 4  ;;  %v2594_v51 = vrot.slane %v2593_v19, 4 }
 0x1ad   : > { %v2380_v52 = vadd.f32 %v2379_v50, %v2378_v49  ;;  %v2595_v53 = vadd.f32 %v2594_v51, %v2593_v19 }
 0x1af   : > { %v2381_v54 = vrot.slane %v2380_v52, 2  ;;  %v2596_v55 = vrot.slane %v2595_v53, 2 }
 0x1b1   : > { %v2382_v56 = vadd.f32 %v2381_v54, %v2380_v52  ;;  %v2597_v58 = vadd.f32 %v2596_v55, %v2595_v53 }
 0x1b3   : > { %v2383_v59 = vrot.slane %v2382_v56, 1  ;;  %v2598_v60 = vrot.slane %v2597_v58, 1 }
 0x1b5   : > { %v2384_v61 = vadd.f32 %v2383_v59, %v2382_v56  ;;  %v2599_v62 = vadd.f32 %v2598_v60, %v2597_v58  ;;  %2619 = sbr.rel (%p3110_p9) target bundleno = 867 (0x363), region = 101 }
 0x1b7   : > { %v2611_v0 = vsel %vm2610_vm6, %v4165_v57, %v2384_v61  ;;  %v3545_v57 = vld [vmem:[%s4256_s6] sm:$0xff] (!%p3110_p9)  }
 0x1b8   : > { %v2613_v1 = vsel %vm2612_vm7, %v2611_v0, %v2599_v62  ;;  %3414 = vmatpush3.bf16.msra.mxu1 (!%p3110_p9), %v3545_v57 }
 0x1b9   : > { %v2614_v41 = vadd.f32 %v2613_v1, %v2600_v63  ;;  %3415 = vmatprep.subr.bf16.mxu1 (!%p3110_p9), %v3610_v3 }
 0x1bb   : > { %2615 = vst [vmem:[#allocation2] sm:$0xff] %v2614_v41 }
 0x1bc   : > { %3416 = vmatpush3.bf16.msra.mxu1 %v3546_v6 }
 0x1bd   : > { %3417 = vmatprep.subr.bf16.mxu1 %v3610_v3 }
 0x1c0   : > { %3418 = vmatpush3.bf16.msra.mxu1 %v3547_v8 }
 0x1c1   : > { %3419 = vmatprep.subr.bf16.mxu1 %v3610_v3 }
 0x1c2   : > { %v2620_v20 = vld [vmem:[#allocation2] sm:$0xff] }
 0x1c3   : > { %v2621_v21 = vmul.f32 0.00390625, %v2620_v20 }
 0x1c4   : > { %3420 = vmatpush3.bf16.msra.mxu1 %v3548_v9 }
 0x1c5   : > { %3421 = vmatprep.subr.bf16.mxu1 %v3610_v3 }
 0x1c8   : > { %3422 = vmatpush3.bf16.msra.mxu1 %v3549_v10 }
 0x1c9   : > { %3423 = vmatprep.subr.bf16.mxu1 %v3610_v3 }
 0x1cc   : > { %3424 = vmatpush3.bf16.msra.mxu1 %v3550_v11 }
 0x1cd   : > { %3425 = vmatprep.subr.bf16.mxu1 %v3610_v3 }
 0x1d0   : > { %3426 = vmatpush3.bf16.msra.mxu1 %v3551_v12 }
 0x1d1   : > { %3427 = vmatprep.subr.bf16.mxu1 %v3610_v3 }
 0x1d4   : > { %3428 = vmatpush3.bf16.msra.mxu1 %v3552_v13 }
 0x27a   : > { %v2684_v15 = vpop.f32.mrb[0].mxu0 }
 0x27b   : > { %v2685_v16 = vadd.f32 %v3111_v14, %v2684_v15  ;;  %v3411_v17 = vpop.f32.mrb[1].mxu0 }
 0x27c   : > { %v2687_v18 = vpop.f32.mrb[2].mxu0 }
 0x27d   : > { %3553 = vtanh.f32 %v2685_v16  ;;  %v3412_v5 = vpop.f32.mrb[3].mxu0 }
 0x287   : > { %v3554_v22 = vpop.eup %3553 }
 0x288   : > { %v2691_v23 = vmul.f32 %v3554_v22, %v2621_v21 }
 0x28a   : > { %v2692_v24 = vpack.c.bf16 %v2691_v23, %v2691_v23 }
 0x28c   : > { %3430 = vmatmul.mubr.bf16.vlgmr.msra.gmra.mrb[0].mxu1 %v2692_v24 }
 0x35f   : > { %v2798_v26 = vpop.f32.mrb[0].mxu1 }
 0x360   : > { %v2799_v27 = vadd.f32 %v3115_v25, %v2798_v26  ;;  %v3431_v28 = vpop.f32.mrb[1].mxu1 }
 0x361   : > { %v2801_v29 = vpop.f32.mrb[2].mxu1 }
 0x362   : > { %2804 = vst [vmem:[#allocation4] sm:$0xff] %v2799_v27  ;;  %v3432_v30 = vpop.f32.mrb[3].mxu1 }
 0x363 PF: > { %p3445_p10 = scmp.eq.s32.totalorder %s3674_s30, 1  ;;  %s3612_s23 = smov [#allocation4]  }
 0x364   : > { %s2812_s24 = sshll.u32 %s3612_s23, 4  ;;  %s2813_s24 = int_to_ptr.vmem [resolvable:$true] %s2812_s24 }
 0x365   : > { %s3555_s25 = scalar_lea.vmem %s2813_s24, 128  ;;  %p3562_p0 = scmp.lt.s32.totalorder %s2813_s24, %s2813_s24 }
 0x366   : > { %p3556_p11 = scmp.ne.s32.totalorder %s2813_s24, %s3555_s25  ;;  %p3563_p1 = scmp.lt.s32.totalorder %s3555_s25, %s3555_s25 }
 0x368   : > { %p3557_p12 = pnand %p3556_p11, %p3445_p10  ;;  %p3564_p2 = por %p3563_p1, %p3562_p0 }
 0x36a   : > { %p3558_p13 = pneg %p3557_p12 }
 0x36c   : > { %p3565_p3 = pnand %p3564_p2, %p3558_p13 }
 0x36e   : > { %3568 = shalt.err (!%p3565_p3)
}
 0x36f   : > { %s3569_s29 = scalar_lea.hbm %s4258_s8, 128 }
 0x370   : > { %p3570_p4 = scmp.ne.s32.totalorder %s4258_s8, %s3569_s29  ;;  %p3575_p7 = scmp.lt.u32.totalorder %s3569_s29, %s4258_s8 }
 0x372   : > { %p3571_p5 = pnand %p3570_p4, %p3445_p10 }
 0x374   : > { %p3572_p6 = pneg %p3571_p5 }
 0x376   : > { %p3577_p8 = pnand %p3575_p7, %p3572_p6 }
 0x378   : > { %3580 = shalt.err (!%p3577_p8)
}
 0x379   : > { %3442 = dma.vmem_to_hbm [thread:$0]  (%p3445_p10), %s2813_s24, 128, %s4258_s8, [#allocation5]  }
 0x37a   : > { %3594 = dma.done.wait (%p3445_p10), [#allocation5], 128  }
 0x37b   : > { %3596 = vsyncadd (%p3445_p10), [#allocation5], 4294967168 }
 0x37c PF: > { %p16_p9 = scmp.ge.s32.totalorder %s3677_s9, 4   ;;  %s4259_s27 = smov %s3603_s28 }
 0x37d   : > { %s4260_s28 = smov %s3686_s12  ;;  %s4261_s29 = smov %s3677_s9 }
 0x37e   :  { %18 = sbr.rel (!%p16_p9) target bundleno = 2 (0x2), region = 140 }
 0x385   :  { %2825 = vsyncpa [#allocation5], 1 }
 0x386   :  { %2827 = vsyncpa [#allocation5 + $0x1], 1 }

</bundles_post_ra>
